<compile_context>
chip_gen: v7x
topology: tpu7x:2x2x1
jax: 0.10.0
libtpu: 0.0.40
codegen_flags: <defaults>
</compile_context>

<pallas_src>
import functools

import jax
import jax.numpy as jnp
from jax.experimental import pallas as pl
from jax.experimental.pallas import tpu as pltpu

BN_EPS = 1e-5
LRELU_SLOPE = 0.2
LANES = 128          # pad every kernel-output channel dim to a full lane width


def _vmem_spec():
    return pl.BlockSpec(memory_space=pltpu.MemorySpace.VMEM)


# ------------------------------ Pallas kernels ------------------------------

def _conv_bn_lrelu_kernel(p_ref, w_ref, g_ref, b_ref, o_ref):
    """(M, K)bf16 @ (K, 128)bf16 -> train-mode BN over rows -> LeakyReLU(0.2).

    No conv bias: BatchNorm's mean subtraction cancels it.  Padded lanes have
    zero weight columns and gamma = beta = 0, so they stay exactly 0.
    Output is stored in bf16 (next layer consumes bf16 patches anyway).
    """
    y = jnp.dot(p_ref[...], w_ref[...], preferred_element_type=jnp.float32)
    mean = jnp.mean(y, axis=0, keepdims=True)
    var = jnp.mean(jnp.square(y - mean), axis=0, keepdims=True)
    yn = (y - mean) * jax.lax.rsqrt(var + BN_EPS) * g_ref[...] + b_ref[...]
    o_ref[...] = jnp.where(yn > 0, yn, LRELU_SLOPE * yn).astype(o_ref.dtype)


def _tail_kernel(p_ref, w1_ref, g_ref, b_ref, w2_ref, bias_ref, dmask_ref, o_ref):
    """Fused d_layer + q_layer tail.

    p:     (M, K)    bf16  shared h-patches for d_layer and q_layer[0]
    w1:    (K, 128)  bf16  lanes [0,Cq1) = Wq1, lane d_lane = Wd, rest 0
    g/b:   (1, 128)  f32   q1 BN gamma/beta on lanes [0,Cq1), 0 elsewhere
    w2:    (128,128) bf16  rows [0,Cq1) x lanes [0,Cq2) = Wq2 (1x1 conv), rest 0
    bias:  (1, 128)  f32   lanes [0,Cq2) = q2 bias, lane d_lane = d bias, rest 0
    dmask: (1, 128)  f32   1.0 at lane d_lane, 0 elsewhere
    o:     (M, 128)  f32   lanes [0,Cq2) = q_pred, lane d_lane = disc_pred
    """
    y = jnp.dot(p_ref[...], w1_ref[...], preferred_element_type=jnp.float32)
    # BN + LeakyReLU for the q1 branch (gamma/beta zero outside its lanes, so
    # the d column and padding lanes come out of this as exact zeros).
    mean = jnp.mean(y, axis=0, keepdims=True)
    var = jnp.mean(jnp.square(y - mean), axis=0, keepdims=True)
    yn = (y - mean) * jax.lax.rsqrt(var + BN_EPS) * g_ref[...] + b_ref[...]
    q1 = jnp.where(yn > 0, yn, LRELU_SLOPE * yn)
    # q2: 1x1 conv == linear on the q1 activations (still in registers).
    q2 = jnp.dot(q1.astype(jnp.bfloat16), w2_ref[...],
                 preferred_element_type=jnp.float32)
    # Stitch the raw d-layer conv output (lane d_lane of y) back in, add biases.
    o_ref[...] = q2 + y * dmask_ref[...] + bias_ref[...]


# ------------------------------ pallas_call wrappers ------------------------

def _conv_bn_lrelu(p, wm, gamma, beta):
    m = p.shape[0]
    return pl.pallas_call(
        _conv_bn_lrelu_kernel,
        out_shape=jax.ShapeDtypeStruct((m, LANES), jnp.bfloat16),
        in_specs=[_vmem_spec()] * 4,
        out_specs=_vmem_spec(),
    )(p, wm, gamma, beta)


def _tail(p, w1, gamma, beta, w2, bias, dmask):
    m = p.shape[0]
    return pl.pallas_call(
        _tail_kernel,
        out_shape=jax.ShapeDtypeStruct((m, LANES), jnp.float32),
        in_specs=[_vmem_spec()] * 7,
        out_specs=_vmem_spec(),
    )(p, w1, gamma, beta, w2, bias, dmask)


# ------------------------------ JAX glue ------------------------------------

def _patches_nhwc(x, k, s):
    """x: (N, H, W, C) NHWC -> (N*OH*OW, k*k*C), tap order (kh, kw, c)."""
    n, h, w, c = x.shape
    oh = (h - k) // s + 1
    ow = (w - k) // s + 1
    taps = []
    for i in range(k):
        for j in range(k):
            taps.append(x[:, i:i + s * (oh - 1) + 1:s,
                             j:j + s * (ow - 1) + 1:s, :])       # (N, OH, OW, C)
    p = jnp.concatenate(taps, axis=-1)                           # (N, OH, OW, k*k*C)
    return p.reshape(n * oh * ow, k * k * c), oh, ow


def _conv_w_matrix(w, cout_pad=None):
    """PyTorch (Cout, Cin, kH, kW) -> (kH*kW*Cin, Cout[, zero-padded])."""
    cout = w.shape[0]
    wm = jnp.transpose(w, (2, 3, 1, 0)).reshape(-1, cout)
    if cout_pad is not None and cout_pad > cout:
        wm = jnp.pad(wm, ((0, 0), (0, cout_pad - cout)))
    return wm


def _pad_row(v, width):
    v = v.reshape(1, -1).astype(jnp.float32)
    return jnp.pad(v, ((0, 0), (0, width - v.shape[-1])))


def init_params(key, im_chan=1, hidden_dim=32, c_dim=2):
    def conv_init(k_, cout, cin, ksz):
        kw, kb = jax.random.split(k_)
        fan_in = cin * ksz * ksz
        bound = 1.0 / (fan_in ** 0.5)
        w = jax.random.uniform(kw, (cout, cin, ksz, ksz), jnp.float32, -bound, bound)
        b = jax.random.uniform(kb, (cout,), jnp.float32, -bound, bound)
        return w, b

    keys = jax.random.split(key, 5)
    params = {
        "disc1": conv_init(keys[0], hidden_dim, im_chan, 4)
                 + (jnp.ones(hidden_dim), jnp.zeros(hidden_dim)),
        "disc2": conv_init(keys[1], 2 * hidden_dim, hidden_dim, 4)
                 + (jnp.ones(2 * hidden_dim), jnp.zeros(2 * hidden_dim)),
        "d": conv_init(keys[2], 1, 2 * hidden_dim, 4),
        "q1": conv_init(keys[3], 2 * hidden_dim, 2 * hidden_dim, 4)
              + (jnp.ones(2 * hidden_dim), jnp.zeros(2 * hidden_dim)),
        "q2": conv_init(keys[4], 2 * c_dim, 2 * hidden_dim, 1),
    }
    return params


def pack_params(params):
    """One-time re-layout of PyTorch-style params into Pallas-ready operands.

    Returns (packed_arrays, static_meta).  Done outside the jitted forward so
    the per-call graph contains no weight padding/transpose ops.
    """
    w1c, _, g1, b1 = params["disc1"]
    w2c, _, g2, b2 = params["disc2"]
    wd, bd = params["d"]
    wq1, _, gq, btq = params["q1"]
    wq2, bq2 = params["q2"]

    c1, c2 = w1c.shape[0], w2c.shape[0]
    cq1, cq2 = wq1.shape[0], wq2.shape[0]
    d_lane = cq1                               # disc_pred lives in this lane
    assert cq1 + 1 <= LANES and cq2 <= cq1     # q lanes must not overlap d lane

    k_tail = wq1.shape[1] * wq1.shape[2] * wq1.shape[3]
    wt1 = jnp.zeros((k_tail, LANES), jnp.float32)
    wt1 = wt1.at[:, :cq1].set(_conv_w_matrix(wq1))
    wt1 = wt1.at[:, d_lane:d_lane + 1].set(_conv_w_matrix(wd))

    wt2 = jnp.zeros((LANES, LANES), jnp.float32)
    wt2 = wt2.at[:cq1, :cq2].set(_conv_w_matrix(wq2))

    tail_bias = jnp.zeros((1, LANES), jnp.float32)
    tail_bias = tail_bias.at[0, :cq2].set(bq2)
    tail_bias = tail_bias.at[0, d_lane].set(bd[0])
    dmask = jnp.zeros((1, LANES), jnp.float32).at[0, d_lane].set(1.0)

    packed = {
        "w1m": _conv_w_matrix(w1c, LANES).astype(jnp.bfloat16),
        "g1": _pad_row(g1, LANES), "b1": _pad_row(b1, LANES),
        "w2m": _conv_w_matrix(w2c, LANES).astype(jnp.bfloat16),
        "g2": _pad_row(g2, LANES), "b2": _pad_row(b2, LANES),
        "wt1": wt1.astype(jnp.bfloat16), "wt2": wt2.astype(jnp.bfloat16),
        "gq": _pad_row(gq, LANES), "bq": _pad_row(btq, LANES),
        "tail_bias": tail_bias, "dmask": dmask,
    }
    meta = {"c1": int(c1), "c2": int(c2), "cq2": int(cq2), "d_lane": int(d_lane)}
    return packed, meta


def discriminator_forward(packed, image, *, meta):
    """image: NCHW float32 -> (disc_pred (N,1), q_pred (N, 2*c_dim))."""
    n = image.shape[0]
    c1, c2, cq2, d_lane = meta["c1"], meta["c2"], meta["cq2"], meta["d_lane"]
    x = jnp.transpose(image, (0, 2, 3, 1)).astype(jnp.bfloat16)    # NHWC, once

    # ---- disc block 1: conv(k4, s2) + BN + LReLU --------------------------
    p, oh, ow = _patches_nhwc(x, 4, 2)
    h = _conv_bn_lrelu(p, packed["w1m"], packed["g1"], packed["b1"])
    h = h[:, :c1].reshape(n, oh, ow, c1)                           # NHWC, bf16

    # ---- disc block 2: conv(k4, s2) + BN + LReLU --------------------------
    p, oh, ow = _patches_nhwc(h, 4, 2)
    h = _conv_bn_lrelu(p, packed["w2m"], packed["g2"], packed["b2"])
    h = h[:, :c2].reshape(n, oh, ow, c2)                           # intermediate_pred

    # ---- fused tail: d_layer + q_layer in a single pallas_call ------------
    p, ohd, owd = _patches_nhwc(h, 4, 2)           # shared LHS for d and q1
    out = _tail(p, packed["wt1"], packed["gq"], packed["bq"],
                packed["wt2"], packed["tail_bias"], packed["dmask"])

    d = out[:, d_lane:d_lane + 1].reshape(n, ohd, owd, 1)
    q = out[:, :cq2].reshape(n, ohd, owd, cq2)
    q = q[:, ::2, ::2, :]                          # k=1, s=2 q2 conv spatial subsample
    d = jnp.transpose(d, (0, 3, 1, 2)).reshape(n, -1)
    q = jnp.transpose(q, (0, 3, 1, 2)).reshape(n, -1)
    return d, q


# ------------------------- pure-JAX reference (sanity check) ----------------

def _ref_forward(params, image):
    def conv(x, w, b, s):
        y = jax.lax.conv_general_dilated(
            x, w, (s, s), "VALID", dimension_numbers=("NCHW", "OIHW", "NCHW"))
        return y + b.reshape(1, -1, 1, 1)

    def bn_lrelu(y, g, bt):
        mean = jnp.mean(y, axis=(0, 2, 3), keepdims=True)
        var = jnp.mean(jnp.square(y - mean), axis=(0, 2, 3), keepdims=True)
        yn = (y - mean) / jnp.sqrt(var + BN_EPS)
        yn = yn * g.reshape(1, -1, 1, 1) + bt.reshape(1, -1, 1, 1)
        return jnp.where(yn > 0, yn, LRELU_SLOPE * yn)

    w, b, g, bt = params["disc1"]
    h = bn_lrelu(conv(image, w, b, 2), g, bt)
    w, b, g, bt = params["disc2"]
    h = bn_lrelu(conv(h, w, b, 2), g, bt)
    w, b = params["d"]
    d = conv(h, w, b, 2)
    w, b, g, bt = params["q1"]
    q = bn_lrelu(conv(h, w, b, 2), g, bt)
    w, b = params["q2"]
    q = conv(q, w, b, 2)
    n = image.shape[0]
    return d.reshape(n, -1), q.reshape(n, -1)


if __name__ == "__main__":
    key = jax.random.PRNGKey(0)
    k_img, k_par = jax.random.split(key)

    # MNIST-like input: 28x28 is the smallest spatial size the architecture
    # supports cleanly; small batch / hidden_dim / c_dim.
    batch, im_chan, hidden_dim, c_dim = 2, 1, 32, 2
    image = jax.random.normal(k_img, (batch, im_chan, 28, 28), jnp.float32)
    params = init_params(k_par, im_chan=im_chan, hidden_dim=hidden_dim, c_dim=c_dim)

    packed, meta = pack_params(params)
    fwd = jax.jit(functools.partial(discriminator_forward, meta=meta))
    disc_pred, q_pred = fwd(packed, image)
    jax.block_until_ready((disc_pred, q_pred))

    assert disc_pred.shape == (batch, 1)
    assert q_pred.shape == (batch, 2 * c_dim)

    # bf16 MXU operands / bf16 inter-layer activations vs. f32 reference.
    d_ref, q_ref = _ref_forward(params, image)
    assert jnp.allclose(disc_pred, d_ref, rtol=5e-2, atol=5e-2)
    assert jnp.allclose(q_pred, q_ref, rtol=5e-2, atol=5e-2)

    print("KERNEL_OK")
</pallas_src>

<mosaic_0001>
module attributes {stable_mosaic.version = 11 : i64} {
  func.func @_conv_bn_lrelu_kernel(%arg0: memref<338x16xbf16, #tpu.memory_space<vmem>>, %arg1: memref<16x128xbf16, #tpu.memory_space<vmem>>, %arg2: memref<1x128xf32, #tpu.memory_space<vmem>>, %arg3: memref<1x128xf32, #tpu.memory_space<vmem>>, %arg4: memref<338x128xbf16, #tpu.memory_space<vmem>>) attributes {dimension_semantics = [], scalar_prefetch = 0 : i64, scratch_operands = 0 : i64, tpu.core_type = #tpu.core_type<tc>} {
    %c0 = arith.constant 0 : index
    %c0_0 = arith.constant 0 : index
    %0 = vector.load %arg0[%c0, %c0_0] : memref<338x16xbf16, #tpu.memory_space<vmem>>, vector<338x16xbf16>
    %c0_1 = arith.constant 0 : index
    %c0_2 = arith.constant 0 : index
    %1 = vector.load %arg1[%c0_1, %c0_2] : memref<16x128xbf16, #tpu.memory_space<vmem>>, vector<16x128xbf16>
    %cst = arith.constant dense<0.000000e+00> : vector<338x128xf32>
    %2 = tpu.matmul %0, %1, %cst {dimension_numbers = #tpu.dot_dimension_numbers<[1], [0], [0], [1], [0, 0, 1, 1], [], []>} : vector<338x16xbf16>, vector<16x128xbf16>, vector<338x128xf32> -> vector<338x128xf32>
    %cst_3 = arith.constant dense<0.000000e+00> : vector<128xf32>
    %3 = vector.multi_reduction <add>, %2, %cst_3 [0] : vector<338x128xf32> to vector<128xf32>
    %4 = vector.shape_cast %3 : vector<128xf32> to vector<1x128xf32>
    %cst_4 = arith.constant 3.380000e+02 : f32
    %5 = vector.broadcast %cst_4 : f32 to vector<1x128xf32>
    %6 = arith.divf %4, %5 : vector<1x128xf32>
    %7 = vector.broadcast %6 : vector<1x128xf32> to vector<338x128xf32>
    %8 = arith.subf %2, %7 : vector<338x128xf32>
    %9 = arith.mulf %8, %8 : vector<338x128xf32>
    %cst_5 = arith.constant dense<0.000000e+00> : vector<128xf32>
    %10 = vector.multi_reduction <add>, %9, %cst_5 [0] : vector<338x128xf32> to vector<128xf32>
    %11 = vector.shape_cast %10 : vector<128xf32> to vector<1x128xf32>
    %cst_6 = arith.constant 3.380000e+02 : f32
    %12 = vector.broadcast %cst_6 : f32 to vector<1x128xf32>
    %13 = arith.divf %11, %12 : vector<1x128xf32>
    %14 = vector.broadcast %6 : vector<1x128xf32> to vector<338x128xf32>
    %15 = arith.subf %2, %14 : vector<338x128xf32>
    %cst_7 = arith.constant 9.99999974E-6 : f32
    %16 = vector.broadcast %cst_7 : f32 to vector<1x128xf32>
    %17 = arith.addf %13, %16 : vector<1x128xf32>
    %18 = math.rsqrt %17 : vector<1x128xf32>
    %19 = vector.broadcast %18 : vector<1x128xf32> to vector<338x128xf32>
    %20 = arith.mulf %15, %19 : vector<338x128xf32>
    %c0_8 = arith.constant 0 : index
    %c0_9 = arith.constant 0 : index
    %21 = vector.load %arg2[%c0_8, %c0_9] : memref<1x128xf32, #tpu.memory_space<vmem>>, vector<1x128xf32>
    %22 = vector.broadcast %21 : vector<1x128xf32> to vector<338x128xf32>
    %23 = arith.mulf %20, %22 : vector<338x128xf32>
    %c0_10 = arith.constant 0 : index
    %c0_11 = arith.constant 0 : index
    %24 = vector.load %arg3[%c0_10, %c0_11] : memref<1x128xf32, #tpu.memory_space<vmem>>, vector<1x128xf32>
    %25 = vector.broadcast %24 : vector<1x128xf32> to vector<338x128xf32>
    %26 = arith.addf %23, %25 : vector<338x128xf32>
    %cst_12 = arith.constant 0.000000e+00 : f32
    %27 = vector.broadcast %cst_12 : f32 to vector<338x128xf32>
    %28 = arith.cmpf ogt, %26, %27 : vector<338x128xf32>
    %cst_13 = arith.constant 2.000000e-01 : f32
    %29 = vector.broadcast %cst_13 : f32 to vector<338x128xf32>
    %30 = arith.mulf %29, %26 : vector<338x128xf32>
    %31 = arith.select %28, %26, %30 : vector<338x128xi1>, vector<338x128xf32>
    %32 = arith.truncf %31 : vector<338x128xf32> to vector<338x128xbf16>
    %c0_14 = arith.constant 0 : index
    %c0_15 = arith.constant 0 : index
    %33 = vector.load %arg4[%c0_14, %c0_15] : memref<338x128xbf16, #tpu.memory_space<vmem>>, vector<338x128xbf16>
    tpu.vector_store %arg4[%c0_14, %c0_15], %32 {strides = array<i32>} : memref<338x128xbf16, #tpu.memory_space<vmem>>, vector<338x128xbf16>,
    return
  }
}

module attributes {stable_mosaic.version = 11 : i64} {
  func.func @_conv_bn_lrelu_kernel(%arg0: memref<50x512xbf16, #tpu.memory_space<vmem>>, %arg1: memref<512x128xbf16, #tpu.memory_space<vmem>>, %arg2: memref<1x128xf32, #tpu.memory_space<vmem>>, %arg3: memref<1x128xf32, #tpu.memory_space<vmem>>, %arg4: memref<50x128xbf16, #tpu.memory_space<vmem>>) attributes {dimension_semantics = [], scalar_prefetch = 0 : i64, scratch_operands = 0 : i64, tpu.core_type = #tpu.core_type<tc>} {
    %c0 = arith.constant 0 : index
    %c0_0 = arith.constant 0 : index
    %0 = vector.load %arg0[%c0, %c0_0] : memref<50x512xbf16, #tpu.memory_space<vmem>>, vector<50x512xbf16>
    %c0_1 = arith.constant 0 : index
    %c0_2 = arith.constant 0 : index
    %1 = vector.load %arg1[%c0_1, %c0_2] : memref<512x128xbf16, #tpu.memory_space<vmem>>, vector<512x128xbf16>
    %cst = arith.constant dense<0.000000e+00> : vector<50x128xf32>
    %2 = tpu.matmul %0, %1, %cst {dimension_numbers = #tpu.dot_dimension_numbers<[1], [0], [0], [1], [0, 0, 1, 1], [], []>} : vector<50x512xbf16>, vector<512x128xbf16>, vector<50x128xf32> -> vector<50x128xf32>
    %cst_3 = arith.constant dense<0.000000e+00> : vector<128xf32>
    %3 = vector.multi_reduction <add>, %2, %cst_3 [0] : vector<50x128xf32> to vector<128xf32>
    %4 = vector.shape_cast %3 : vector<128xf32> to vector<1x128xf32>
    %cst_4 = arith.constant 5.000000e+01 : f32
    %5 = vector.broadcast %cst_4 : f32 to vector<1x128xf32>
    %6 = arith.divf %4, %5 : vector<1x128xf32>
    %7 = vector.broadcast %6 : vector<1x128xf32> to vector<50x128xf32>
    %8 = arith.subf %2, %7 : vector<50x128xf32>
    %9 = arith.mulf %8, %8 : vector<50x128xf32>
    %cst_5 = arith.constant dense<0.000000e+00> : vector<128xf32>
    %10 = vector.multi_reduction <add>, %9, %cst_5 [0] : vector<50x128xf32> to vector<128xf32>
    %11 = vector.shape_cast %10 : vector<128xf32> to vector<1x128xf32>
    %cst_6 = arith.constant 5.000000e+01 : f32
    %12 = vector.broadcast %cst_6 : f32 to vector<1x128xf32>
    %13 = arith.divf %11, %12 : vector<1x128xf32>
    %14 = vector.broadcast %6 : vector<1x128xf32> to vector<50x128xf32>
    %15 = arith.subf %2, %14 : vector<50x128xf32>
    %cst_7 = arith.constant 9.99999974E-6 : f32
    %16 = vector.broadcast %cst_7 : f32 to vector<1x128xf32>
    %17 = arith.addf %13, %16 : vector<1x128xf32>
    %18 = math.rsqrt %17 : vector<1x128xf32>
    %19 = vector.broadcast %18 : vector<1x128xf32> to vector<50x128xf32>
    %20 = arith.mulf %15, %19 : vector<50x128xf32>
    %c0_8 = arith.constant 0 : index
    %c0_9 = arith.constant 0 : index
    %21 = vector.load %arg2[%c0_8, %c0_9] : memref<1x128xf32, #tpu.memory_space<vmem>>, vector<1x128xf32>
    %22 = vector.broadcast %21 : vector<1x128xf32> to vector<50x128xf32>
    %23 = arith.mulf %20, %22 : vector<50x128xf32>
    %c0_10 = arith.constant 0 : index
    %c0_11 = arith.constant 0 : index
    %24 = vector.load %arg3[%c0_10, %c0_11] : memref<1x128xf32, #tpu.memory_space<vmem>>, vector<1x128xf32>
    %25 = vector.broadcast %24 : vector<1x128xf32> to vector<50x128xf32>
    %26 = arith.addf %23, %25 : vector<50x128xf32>
    %cst_12 = arith.constant 0.000000e+00 : f32
    %27 = vector.broadcast %cst_12 : f32 to vector<50x128xf32>
    %28 = arith.cmpf ogt, %26, %27 : vector<50x128xf32>
    %cst_13 = arith.constant 2.000000e-01 : f32
    %29 = vector.broadcast %cst_13 : f32 to vector<50x128xf32>
    %30 = arith.mulf %29, %26 : vector<50x128xf32>
    %31 = arith.select %28, %26, %30 : vector<50x128xi1>, vector<50x128xf32>
    %32 = arith.truncf %31 : vector<50x128xf32> to vector<50x128xbf16>
    %c0_14 = arith.constant 0 : index
    %c0_15 = arith.constant 0 : index
    %33 = vector.load %arg4[%c0_14, %c0_15] : memref<50x128xbf16, #tpu.memory_space<vmem>>, vector<50x128xbf16>
    tpu.vector_store %arg4[%c0_14, %c0_15], %32 {strides = array<i32>} : memref<50x128xbf16, #tpu.memory_space<vmem>>, vector<50x128xbf16>,
    return
  }
}

module attributes {stable_mosaic.version = 11 : i64} {
  func.func @_tail_kernel(%arg0: memref<2x1024xbf16, #tpu.memory_space<vmem>>, %arg1: memref<1024x128xbf16, #tpu.memory_space<vmem>>, %arg2: memref<1x128xf32, #tpu.memory_space<vmem>>, %arg3: memref<1x128xf32, #tpu.memory_space<vmem>>, %arg4: memref<128x128xbf16, #tpu.memory_space<vmem>>, %arg5: memref<1x128xf32, #tpu.memory_space<vmem>>, %arg6: memref<1x128xf32, #tpu.memory_space<vmem>>, %arg7: memref<2x128xf32, #tpu.memory_space<vmem>>) attributes {dimension_semantics = [], scalar_prefetch = 0 : i64, scratch_operands = 0 : i64, tpu.core_type = #tpu.core_type<tc>} {
    %c0 = arith.constant 0 : index
    %c0_0 = arith.constant 0 : index
    %0 = vector.load %arg0[%c0, %c0_0] : memref<2x1024xbf16, #tpu.memory_space<vmem>>, vector<2x1024xbf16>
    %c0_1 = arith.constant 0 : index
    %c0_2 = arith.constant 0 : index
    %1 = vector.load %arg1[%c0_1, %c0_2] : memref<1024x128xbf16, #tpu.memory_space<vmem>>, vector<1024x128xbf16>
    %cst = arith.constant dense<0.000000e+00> : vector<2x128xf32>
    %2 = tpu.matmul %0, %1, %cst {dimension_numbers = #tpu.dot_dimension_numbers<[1], [0], [0], [1], [0, 0, 1, 1], [], []>} : vector<2x1024xbf16>, vector<1024x128xbf16>, vector<2x128xf32> -> vector<2x128xf32>
    %cst_3 = arith.constant dense<0.000000e+00> : vector<128xf32>
    %3 = vector.multi_reduction <add>, %2, %cst_3 [0] : vector<2x128xf32> to vector<128xf32>
    %4 = vector.shape_cast %3 : vector<128xf32> to vector<1x128xf32>
    %cst_4 = arith.constant 2.000000e+00 : f32
    %5 = vector.broadcast %cst_4 : f32 to vector<1x128xf32>
    %6 = arith.divf %4, %5 : vector<1x128xf32>
    %7 = vector.broadcast %6 : vector<1x128xf32> to vector<2x128xf32>
    %8 = arith.subf %2, %7 : vector<2x128xf32>
    %9 = arith.mulf %8, %8 : vector<2x128xf32>
    %cst_5 = arith.constant dense<0.000000e+00> : vector<128xf32>
    %10 = vector.multi_reduction <add>, %9, %cst_5 [0] : vector<2x128xf32> to vector<128xf32>
    %11 = vector.shape_cast %10 : vector<128xf32> to vector<1x128xf32>
    %cst_6 = arith.constant 2.000000e+00 : f32
    %12 = vector.broadcast %cst_6 : f32 to vector<1x128xf32>
    %13 = arith.divf %11, %12 : vector<1x128xf32>
    %14 = vector.broadcast %6 : vector<1x128xf32> to vector<2x128xf32>
    %15 = arith.subf %2, %14 : vector<2x128xf32>
    %cst_7 = arith.constant 9.99999974E-6 : f32
    %16 = vector.broadcast %cst_7 : f32 to vector<1x128xf32>
    %17 = arith.addf %13, %16 : vector<1x128xf32>
    %18 = math.rsqrt %17 : vector<1x128xf32>
    %19 = vector.broadcast %18 : vector<1x128xf32> to vector<2x128xf32>
    %20 = arith.mulf %15, %19 : vector<2x128xf32>
    %c0_8 = arith.constant 0 : index
    %c0_9 = arith.constant 0 : index
    %21 = vector.load %arg2[%c0_8, %c0_9] : memref<1x128xf32, #tpu.memory_space<vmem>>, vector<1x128xf32>
    %22 = vector.broadcast %21 : vector<1x128xf32> to vector<2x128xf32>
    %23 = arith.mulf %20, %22 : vector<2x128xf32>
    %c0_10 = arith.constant 0 : index
    %c0_11 = arith.constant 0 : index
    %24 = vector.load %arg3[%c0_10, %c0_11] : memref<1x128xf32, #tpu.memory_space<vmem>>, vector<1x128xf32>
    %25 = vector.broadcast %24 : vector<1x128xf32> to vector<2x128xf32>
    %26 = arith.addf %23, %25 : vector<2x128xf32>
    %cst_12 = arith.constant 0.000000e+00 : f32
    %27 = vector.broadcast %cst_12 : f32 to vector<2x128xf32>
    %28 = arith.cmpf ogt, %26, %27 : vector<2x128xf32>
    %cst_13 = arith.constant 2.000000e-01 : f32
    %29 = vector.broadcast %cst_13 : f32 to vector<2x128xf32>
    %30 = arith.mulf %29, %26 : vector<2x128xf32>
    %31 = arith.select %28, %26, %30 : vector<2x128xi1>, vector<2x128xf32>
    %32 = arith.truncf %31 : vector<2x128xf32> to vector<2x128xbf16>
    %c0_14 = arith.constant 0 : index
    %c0_15 = arith.constant 0 : index
    %33 = vector.load %arg4[%c0_14, %c0_15] : memref<128x128xbf16, #tpu.memory_space<vmem>>, vector<128x128xbf16>
    %cst_16 = arith.constant dense<0.000000e+00> : vector<2x128xf32>
    %34 = tpu.matmul %32, %33, %cst_16 {dimension_numbers = #tpu.dot_dimension_numbers<[1], [0], [0], [1], [0, 0, 1, 1], [], []>} : vector<2x128xbf16>, vector<128x128xbf16>, vector<2x128xf32> -> vector<2x128xf32>
    %c0_17 = arith.constant 0 : index
    %c0_18 = arith.constant 0 : index
    %35 = vector.load %arg6[%c0_17, %c0_18] : memref<1x128xf32, #tpu.memory_space<vmem>>, vector<1x128xf32>
    %36 = vector.broadcast %35 : vector<1x128xf32> to vector<2x128xf32>
    %37 = arith.mulf %2, %36 : vector<2x128xf32>
    %38 = arith.addf %34, %37 : vector<2x128xf32>
    %c0_19 = arith.constant 0 : index
    %c0_20 = arith.constant 0 : index
    %39 = vector.load %arg5[%c0_19, %c0_20] : memref<1x128xf32, #tpu.memory_space<vmem>>, vector<1x128xf32>
    %40 = vector.broadcast %39 : vector<1x128xf32> to vector<2x128xf32>
    %41 = arith.addf %38, %40 : vector<2x128xf32>
    %c0_21 = arith.constant 0 : index
    %c0_22 = arith.constant 0 : index
    %42 = vector.load %arg7[%c0_21, %c0_22] : memref<2x128xf32, #tpu.memory_space<vmem>>, vector<2x128xf32>
    tpu.vector_store %arg7[%c0_21, %c0_22], %41 {strides = array<i32>} : memref<2x128xf32, #tpu.memory_space<vmem>>, vector<2x128xf32>,
    return
  }
}

</mosaic_0001>

<bundles_post_ra>
// kernel: discriminator_forward.3
= control target key start
LH: loop header
LB: loop body
LE: loop exit
PB: predicated region body
PF: predicated region fallthrough
CT: control target
= control target key end

     0   :  { %vm177_vm0 = vcmask 130048   ;;  %vm493_vm1 = vcmask 1041408   ;;  %s2495_s1 = inlined_call_operand.vmem [shape: bf16[16,128], index: 1, kind: input, shape index: {}]   ;;  %s2496_s0 = inlined_call_operand.vmem [shape: bf16[338,16], index: 0, kind: input, shape index: {}]   ;;  %s2497_s2 = inlined_call_operand.vmem [shape: f32[1,128], index: 2, kind: input, shape index: {}]   ;;  %s2498_s3 = inlined_call_operand.vmem [shape: f32[1,128], index: 3, kind: input, shape index: {}]   ;;  %s2499_s4 = inlined_call_operand.vmem [shape: bf16[338,128], index: 4, kind: output, shape index: {}]  }
   0x1   :  { %v1463_v0 = vld [vmem:[%s2495_s1] sm:$0xff]   ;;  %v1465_v2 = vld [vmem:[%s2496_s0 + $0x8] sm:$0xff]   ;;  %v1466_v3 = vld [vmem:[%s2496_s0 + $0x10] sm:$0xff]  }
   0x2   :  { %v1464_v1 = vld [vmem:[%s2496_s0] sm:$0xff]   ;;  %1415 = vmatprep.subr.bf16.mxu0 %v1463_v0  ;;  %1461 = vmatprep.subr.bf16.mxu1 %v1463_v0  ;;  %v1467_v4 = vld [vmem:[%s2496_s0 + $0x18] sm:$0xff]   ;;  %v1477_v7 = vld [vmem:[%s2496_s0 + $0x68] sm:$0xff]  }
   0x3   :  { %1416 = vmatpush3.bf16.msra.mxu0 %v1463_v0  ;;  %1417 = vmatprep.mubr.msk.bf16.mxu0 %vm177_vm0, %v1464_v1  ;;  %v1468_v5 = vld [vmem:[%s2496_s0 + $0x20] sm:$0xff]   ;;  %v1478_v8 = vld [vmem:[%s2496_s0 + $0x70] sm:$0xff]   ;;  %v1469_v9 = vld [vmem:[%s2496_s0 + $0x28] sm:$0xff]  }
   0x4   :  { %1462 = vmatpush3.bf16.msra.mxu1 %v1463_v0  ;;  %v1476_v6 = vld [vmem:[%s2496_s0 + $0x60] sm:$0xff]   ;;  %v1470_v10 = vld [vmem:[%s2496_s0 + $0x30] sm:$0xff]   ;;  %v1479_v11 = vld [vmem:[%s2496_s0 + $0x78] sm:$0xff]  }
   0x5   :  { %1441 = vmatprep.mubr.msk.bf16.mxu1 %vm177_vm0, %v1476_v6  ;;  %v1480_v12 = vld [vmem:[%s2496_s0 + $0x80] sm:$0xff]   ;;  %v1471_v13 = vld [vmem:[%s2496_s0 + $0x38] sm:$0xff]   ;;  %v1481_v15 = vld [vmem:[%s2496_s0 + $0x88] sm:$0xff]  }
   0x6   :  { %1418 = vmatmul.mubr.msk.bf16.vlgmr.msra.gmra.mrb[0].mxu0 %vm177_vm0, %v1465_v2  ;;  %v1472_v14 = vld [vmem:[%s2496_s0 + $0x40] sm:$0xff]   ;;  %v1482_v16 = vld [vmem:[%s2496_s0 + $0x90] sm:$0xff]   ;;  %v1473_v17 = vld [vmem:[%s2496_s0 + $0x48] sm:$0xff]  }
   0x7   :  { %1421 = vmatprep.mubr.msk.bf16.mxu0 %vm177_vm0, %v1466_v3  ;;  %1442 = vmatmul.mubr.msk.bf16.vlgmr.msra.gmra.mrb[0].mxu1 %vm177_vm0, %v1477_v7  ;;  %v1474_v18 = vld [vmem:[%s2496_s0 + $0x50] sm:$0xff]   ;;  %v1483_v19 = vld [vmem:[%s2496_s0 + $0x98] sm:$0xff]   ;;  %v1484_v20 = vld [vmem:[%s2496_s0 + $0xa0] sm:$0xff]  }
   0x8   :  { %1445 = vmatprep.mubr.msk.bf16.mxu1 %vm177_vm0, %v1478_v8  ;;  %v1475_v21 = vld [vmem:[%s2496_s0 + $0x58] sm:$0xff]   ;;  %v1485_v22 = vld [vmem:[%s2496_s0 + $0xa8] ss:$0 sps:$4 sm:$0x11]  }
   0xe   :  { %1422 = vmatmul.mubr.msk.bf16.gmra.mrb[4].mxu0 %vm177_vm0, %v1467_v4 }
   0xf   :  { %1425 = vmatprep.mubr.msk.bf16.mxu0 %vm177_vm0, %v1468_v5  ;;  %1446 = vmatmul.mubr.msk.bf16.gmra.mrb[4].mxu1 %vm177_vm0, %v1479_v11 }
  0x10   :  { %1449 = vmatprep.mubr.msk.bf16.mxu1 %vm177_vm0, %v1480_v12 }
  0x16   :  { %1426 = vmatmul.mubr.msk.bf16.gmra.mrb[8].mxu0 %vm177_vm0, %v1469_v9 }
  0x17   :  { %1429 = vmatprep.mubr.msk.bf16.mxu0 %vm177_vm0, %v1470_v10  ;;  %1450 = vmatmul.mubr.msk.bf16.gmra.mrb[8].mxu1 %vm177_vm0, %v1481_v15 }
  0x18   :  { %1453 = vmatprep.mubr.msk.bf16.mxu1 %vm177_vm0, %v1482_v16 }
  0x1e   :  { %1430 = vmatmul.mubr.msk.bf16.gmra.mrb[12].mxu0 %vm177_vm0, %v1471_v13 }
  0x1f   :  { %1433 = vmatprep.mubr.msk.bf16.mxu0 %vm177_vm0, %v1472_v14  ;;  %1454 = vmatmul.mubr.msk.bf16.gmra.mrb[12].mxu1 %vm177_vm0, %v1483_v19 }
  0x20   :  { %1457 = vmatprep.mubr.msk.bf16.mxu1 %vm177_vm0, %v1484_v20 }
  0x26   :  { %1434 = vmatmul.mubr.msk.bf16.gmra.mrb[16].mxu0 %vm177_vm0, %v1473_v17 }
  0x27   :  { %1437 = vmatprep.mubr.msk.bf16.mxu0 %vm177_vm0, %v1474_v18  ;;  %1458 = vmatmul.mubr.msk.bf16.gmra.mrb[16].mxu1 %vm177_vm0, %v1485_v22 }
  0x2e   :  { %1438 = vmatmul.mubr.msk.bf16.gmra.mrb[20].mxu0 %vm177_vm0, %v1475_v21 }
  0xd9   :  { %v1604_v23 = vpop.f32.mrb[0].mxu0 }
  0xda   :  { %v1606_v24 = vpop.f32.mrb[1].mxu0  ;;  %v1623_v34 = vpop.f32.mrb[0].mxu1 }
  0xdb   :  { %v1608_v25 = vpop.f32.mrb[2].mxu0  ;;  %v1627_v36 = vpop.f32.mrb[1].mxu1 }
  0xdc   :  { %v1610_v26 = vpop.f32.mrb[3].mxu0  ;;  %v1630_v38 = vpop.f32.mrb[2].mxu1 }
  0xdd   :  { %v452_v27 = vadd.f32 %v1610_v26, %v1606_v24  ;;  %v1632_v39 = vpop.f32.mrb[3].mxu1 }
  0xdf   :  { %v453_v28 = vadd.f32 %v1604_v23, %v452_v27 }
  0xe1   :  { %v1615_v29 = vpop.f32.mrb[4].mxu0  ;;  %v454_v30 = vadd.f32 %v1608_v25, %v453_v28 }
  0xe2   :  { %v1618_v31 = vpop.f32.mrb[5].mxu0  ;;  %v1643_v46 = vpop.f32.mrb[4].mxu1 }
  0xe3   :  { %v455_v32 = vadd.f32 %v454_v30, %v1618_v31  ;;  %v1621_v33 = vpop.f32.mrb[6].mxu0  ;;  %v1647_v48 = vpop.f32.mrb[5].mxu1 }
  0xe4   :  { %v1625_v35 = vpop.f32.mrb[7].mxu0  ;;  %v1650_v50 = vpop.f32.mrb[6].mxu1 }
  0xe5   :  { %v456_v37 = vadd.f32 %v455_v32, %v1625_v35  ;;  %v1652_v51 = vpop.f32.mrb[7].mxu1 }
  0xe7   :  { %v457_v40 = vadd.f32 %v1615_v29, %v456_v37 }
  0xe9   :  { %v1635_v41 = vpop.f32.mrb[8].mxu0  ;;  %v458_v42 = vadd.f32 %v1621_v33, %v457_v40 }
  0xea   :  { %v1638_v43 = vpop.f32.mrb[9].mxu0  ;;  %v1663_v58 = vpop.f32.mrb[8].mxu1 }
  0xeb   :  { %v459_v44 = vadd.f32 %v458_v42, %v1638_v43  ;;  %v1641_v45 = vpop.f32.mrb[10].mxu0  ;;  %v1667_v60 = vpop.f32.mrb[9].mxu1 }
  0xec   :  { %v1645_v47 = vpop.f32.mrb[11].mxu0  ;;  %v1670_v62 = vpop.f32.mrb[10].mxu1 }
  0xed   :  { %v460_v49 = vadd.f32 %v459_v44, %v1645_v47  ;;  %v1672_v63 = vpop.f32.mrb[11].mxu1 }
  0xef   :  { %v461_v52 = vadd.f32 %v1635_v41, %v460_v49 }
  0xf1   :  { %v1655_v53 = vpop.f32.mrb[12].mxu0  ;;  %v462_v54 = vadd.f32 %v1641_v45, %v461_v52 }
  0xf2   :  { %v1658_v55 = vpop.f32.mrb[13].mxu0  ;;  %v1683_v6 = vpop.f32.mrb[12].mxu1 }
  0xf3   :  { %v463_v56 = vadd.f32 %v462_v54, %v1658_v55  ;;  %v1661_v57 = vpop.f32.mrb[14].mxu0  ;;  %v1687_v8 = vpop.f32.mrb[13].mxu1 }
  0xf4   :  { %v1665_v59 = vpop.f32.mrb[15].mxu0  ;;  %v1690_v10 = vpop.f32.mrb[14].mxu1 }
  0xf5   :  { %v464_v61 = vadd.f32 %v463_v56, %v1665_v59  ;;  %v1692_v11 = vpop.f32.mrb[15].mxu1 }
  0xf7   :  { %v465_v0 = vadd.f32 %v1655_v53, %v464_v61 }
  0xf9   :  { %v1675_v1 = vpop.f32.mrb[16].mxu0  ;;  %v466_v2 = vadd.f32 %v1661_v57, %v465_v0 }
  0xfa   :  { %v1678_v3 = vpop.f32.mrb[17].mxu0  ;;  %v1698_v18 = vpop.f32.mrb[16].mxu1 }
  0xfb   :  { %v467_v4 = vadd.f32 %v466_v2, %v1678_v3  ;;  %v1681_v5 = vpop.f32.mrb[18].mxu0  ;;  %v1700_v20 = vpop.f32.mrb[17].mxu1 }
  0xfc   :  { %v1685_v7 = vpop.f32.mrb[19].mxu0  ;;  %v1460_v22 = vpop.f32.mrb[18].mxu1 }
  0xfd   :  { %v468_v9 = vadd.f32 %v467_v4, %v1685_v7  ;;  %v1702_v27 = vpop.f32.mrb[19].mxu1  ;;  %v494_v22 = vsel %vm493_vm1, %v1698_v18, 0.0 }
  0xff   :  { %v469_v12 = vadd.f32 %v1675_v1, %v468_v9 }
 0x101   :  { %v1695_v13 = vpop.f32.mrb[20].mxu0  ;;  %v470_v14 = vadd.f32 %v1681_v5, %v469_v12 }
 0x102   :  { %v358_v15 = vpop.f32.mrb[21].mxu0 }
 0x103   :  { %v471_v16 = vadd.f32 %v470_v14, %v358_v15  ;;  %v1440_v17 = vpop.f32.mrb[22].mxu0 }
 0x104   :  { %v361_v19 = vpop.f32.mrb[23].mxu0 }
 0x105   :  { %v472_v21 = vadd.f32 %v471_v16, %v361_v19 }
 0x107   :  { %v473_v28 = vadd.f32 %v1695_v13, %v472_v21 }
 0x109   :  { %v474_v30 = vadd.f32 %v1440_v17, %v473_v28 }
 0x10b   :  { %v475_v32 = vadd.f32 %v474_v30, %v1627_v36 }
 0x10d   :  { %v476_v37 = vadd.f32 %v475_v32, %v1632_v39 }
 0x10f   :  { %v477_v40 = vadd.f32 %v1623_v34, %v476_v37 }
 0x111   :  { %v478_v42 = vadd.f32 %v1630_v38, %v477_v40 }
 0x113   :  { %v479_v44 = vadd.f32 %v478_v42, %v1647_v48 }
 0x115   :  { %v480_v49 = vadd.f32 %v479_v44, %v1652_v51 }
 0x117   :  { %v481_v52 = vadd.f32 %v1643_v46, %v480_v49 }
 0x119   :  { %v482_v54 = vadd.f32 %v1650_v50, %v481_v52 }
 0x11b   :  { %v483_v56 = vadd.f32 %v482_v54, %v1667_v60 }
 0x11d   :  { %v484_v61 = vadd.f32 %v483_v56, %v1672_v63 }
 0x11f   :  { %v485_v0 = vadd.f32 %v1663_v58, %v484_v61 }
 0x121   :  { %v486_v2 = vadd.f32 %v1670_v62, %v485_v0 }
 0x123   :  { %v487_v4 = vadd.f32 %v486_v2, %v1687_v8 }
 0x125   :  { %v488_v9 = vadd.f32 %v487_v4, %v1692_v11 }
 0x127   :  { %v489_v12 = vadd.f32 %v1683_v6, %v488_v9 }
 0x129   :  { %v490_v14 = vadd.f32 %v1690_v10, %v489_v12 }
 0x12b   :  { %v491_v16 = vadd.f32 %v490_v14, %v1700_v20 }
 0x12d   :  { %v492_v21 = vadd.f32 %v491_v16, %v1702_v27 }
 0x12f   :  { %v495_v28 = vadd.f32 %v494_v22, %v492_v21 }
 0x131   :  { %v496_v30 = vrot.slane %v495_v28, 4 }
 0x133   :  { %v497_v32 = vadd.f32 %v496_v30, %v495_v28 }
 0x135   :  { %v498_v37 = vrot.slane %v497_v32, 2 }
 0x137   :  { %v499_v40 = vadd.f32 %v498_v37, %v497_v32 }
 0x139   :  { %v500_v42 = vrot.slane %v499_v40, 1 }
 0x13b   :  { %v501_v44 = vadd.f32 %v500_v42, %v499_v40 }
 0x13d   :  { %v503_v49 = vmul.f32 0.00295858, %v501_v44 }
 0x13f   :  { %v1726_v52 = vsub.f32 %v1606_v24, %v503_v49  ;;  %v1729_v54 = vsub.f32 %v1610_v26, %v503_v49  ;;  %v1732_v56 = vsub.f32 %v1604_v23, %v503_v49  ;;  %v1735_v61 = vsub.f32 %v1608_v25, %v503_v49 }
 0x140   :  { %v1738_v0 = vsub.f32 %v1618_v31, %v503_v49  ;;  %v1741_v2 = vsub.f32 %v1625_v35, %v503_v49  ;;  %v1744_v4 = vsub.f32 %v1615_v29, %v503_v49  ;;  %v1747_v24 = vsub.f32 %v1621_v33, %v503_v49 }
 0x141   :  { %v1750_v26 = vsub.f32 %v1638_v43, %v503_v49  ;;  %v1753_v23 = vsub.f32 %v1645_v47, %v503_v49  ;;  %v1756_v25 = vsub.f32 %v1635_v41, %v503_v49  ;;  %v1759_v31 = vsub.f32 %v1641_v45, %v503_v49 }
 0x142   :  { %v1762_v35 = vsub.f32 %v1658_v55, %v503_v49  ;;  %v1765_v29 = vsub.f32 %v1665_v59, %v503_v49  ;;  %v1768_v33 = vsub.f32 %v1655_v53, %v503_v49  ;;  %v1771_v43 = vsub.f32 %v1661_v57, %v503_v49 }
 0x143   :  { %v1774_v47 = vsub.f32 %v1678_v3, %v503_v49  ;;  %v1777_v41 = vsub.f32 %v1685_v7, %v503_v49  ;;  %v1780_v45 = vsub.f32 %v1675_v1, %v503_v49  ;;  %v1783_v55 = vsub.f32 %v1681_v5, %v503_v49 }
 0x144   :  { %v1785_v59 = vsub.f32 %v358_v15, %v503_v49  ;;  %v1787_v9 = vsub.f32 %v361_v19, %v503_v49  ;;  %v1790_v53 = vsub.f32 %v1695_v13, %v503_v49  ;;  %v1792_v57 = vsub.f32 %v1440_v17, %v503_v49 }
 0x145   :  { %v1795_v3 = vsub.f32 %v1627_v36, %v503_v49  ;;  %v1798_v7 = vsub.f32 %v1632_v39, %v503_v49  ;;  %v1801_v1 = vsub.f32 %v1623_v34, %v503_v49  ;;  %v1804_v5 = vsub.f32 %v1630_v38, %v503_v49 }
 0x146   :  { %v1807_v15 = vsub.f32 %v1647_v48, %v503_v49  ;;  %v1810_v13 = vsub.f32 %v1652_v51, %v503_v49  ;;  %v1813_v17 = vsub.f32 %v1643_v46, %v503_v49  ;;  %v1816_v36 = vsub.f32 %v1650_v50, %v503_v49 }
 0x147   :  { %v1819_v39 = vsub.f32 %v1667_v60, %v503_v49  ;;  %v1822_v34 = vsub.f32 %v1672_v63, %v503_v49  ;;  %v1825_v38 = vsub.f32 %v1663_v58, %v503_v49  ;;  %v1828_v48 = vsub.f32 %v1670_v62, %v503_v49 }
 0x148   :  { %v1831_v51 = vsub.f32 %v1687_v8, %v503_v49  ;;  %v1834_v46 = vsub.f32 %v1692_v11, %v503_v49  ;;  %v1837_v50 = vsub.f32 %v1683_v6, %v503_v49  ;;  %v1840_v60 = vsub.f32 %v1690_v10, %v503_v49 }
 0x149   :  { %v1843_v63 = vsub.f32 %v1700_v20, %v503_v49  ;;  %v1846_v58 = vsub.f32 %v1702_v27, %v503_v49  ;;  %v1849_v62 = vsub.f32 %v1698_v18, %v503_v49  ;;  %v547_v8 = vmul.f32 %v1726_v52, %v1726_v52 }
 0x14a   :  { %v548_v11 = vmul.f32 %v1729_v54, %v1729_v54  ;;  %v549_v6 = vmul.f32 %v1732_v56, %v1732_v56  ;;  %v550_v19 = vmul.f32 %v1735_v61, %v1735_v61  ;;  %v551_v27 = vmul.f32 %v1738_v0, %v1738_v0 }
 0x14b   :  { %v552_v18 = vmul.f32 %v1741_v2, %v1741_v2  ;;  %v553_v16 = vmul.f32 %v1744_v4, %v1744_v4  ;;  %v554_v22 = vmul.f32 %v1747_v24, %v1747_v24  ;;  %v555_v30 = vmul.f32 %v1750_v26, %v1750_v26 }
 0x14c   :  { %v590_v10 = vadd.f32 %v548_v11, %v547_v8  ;;  %v556_v37 = vmul.f32 %v1753_v23, %v1753_v23  ;;  %v557_v42 = vmul.f32 %v1756_v25, %v1756_v25  ;;  %v558_v49 = vmul.f32 %v1759_v31, %v1759_v31 }
 0x14d   :  { %v559_v11 = vmul.f32 %v1762_v35, %v1762_v35 }
 0x14e   :  { %v591_v20 = vadd.f32 %v590_v10, %v549_v6  ;;  %v560_v10 = vmul.f32 %v1765_v29, %v1765_v29 }
 0x150   :  { %v592_v12 = vadd.f32 %v591_v20, %v550_v19  ;;  %v561_v20 = vmul.f32 %v1768_v33, %v1768_v33 }
 0x152   :  { %v593_v14 = vadd.f32 %v592_v12, %v551_v27  ;;  %v562_v12 = vmul.f32 %v1771_v43, %v1771_v43 }
 0x154   :  { %v594_v21 = vadd.f32 %v593_v14, %v552_v18  ;;  %v563_v14 = vmul.f32 %v1774_v47, %v1774_v47 }
 0x156   :  { %v595_v28 = vadd.f32 %v594_v21, %v553_v16  ;;  %v564_v21 = vmul.f32 %v1777_v41, %v1777_v41 }
 0x158   :  { %v596_v32 = vadd.f32 %v595_v28, %v554_v22  ;;  %v565_v28 = vmul.f32 %v1780_v45, %v1780_v45 }
 0x15a   :  { %v597_v40 = vadd.f32 %v596_v32, %v555_v30  ;;  %v566_v32 = vmul.f32 %v1783_v55, %v1783_v55 }
 0x15c   :  { %v598_v44 = vadd.f32 %v597_v40, %v556_v37  ;;  %v567_v40 = vmul.f32 %v1785_v59, %v1785_v59 }
 0x15e   :  { %v599_v8 = vadd.f32 %v598_v44, %v557_v42  ;;  %v568_v44 = vmul.f32 %v1787_v9, %v1787_v9 }
 0x160   :  { %v600_v6 = vadd.f32 %v599_v8, %v558_v49  ;;  %v569_v8 = vmul.f32 %v1790_v53, %v1790_v53 }
 0x162   :  { %v601_v19 = vadd.f32 %v600_v6, %v559_v11  ;;  %v570_v6 = vmul.f32 %v1792_v57, %v1792_v57 }
 0x164   :  { %v602_v27 = vadd.f32 %v601_v19, %v560_v10  ;;  %v571_v19 = vmul.f32 %v1795_v3, %v1795_v3 }
 0x166   :  { %v603_v18 = vadd.f32 %v602_v27, %v561_v20  ;;  %v572_v27 = vmul.f32 %v1798_v7, %v1798_v7 }
 0x168   :  { %v604_v16 = vadd.f32 %v603_v18, %v562_v12  ;;  %v573_v18 = vmul.f32 %v1801_v1, %v1801_v1 }
 0x16a   :  { %v605_v22 = vadd.f32 %v604_v16, %v563_v14  ;;  %v574_v16 = vmul.f32 %v1804_v5, %v1804_v5 }
 0x16c   :  { %v606_v30 = vadd.f32 %v605_v22, %v564_v21  ;;  %v575_v22 = vmul.f32 %v1807_v15, %v1807_v15 }
 0x16e   :  { %v607_v37 = vadd.f32 %v606_v30, %v565_v28  ;;  %v576_v30 = vmul.f32 %v1810_v13, %v1810_v13 }
 0x170   :  { %v608_v42 = vadd.f32 %v607_v37, %v566_v32  ;;  %v577_v37 = vmul.f32 %v1813_v17, %v1813_v17 }
 0x172   :  { %v609_v49 = vadd.f32 %v608_v42, %v567_v40  ;;  %v578_v42 = vmul.f32 %v1816_v36, %v1816_v36 }
 0x174   :  { %v610_v11 = vadd.f32 %v609_v49, %v568_v44  ;;  %v579_v49 = vmul.f32 %v1819_v39, %v1819_v39 }
 0x176   :  { %v611_v10 = vadd.f32 %v610_v11, %v569_v8  ;;  %v580_v11 = vmul.f32 %v1822_v34, %v1822_v34 }
 0x178   :  { %v612_v20 = vadd.f32 %v611_v10, %v570_v6  ;;  %v581_v10 = vmul.f32 %v1825_v38, %v1825_v38 }
 0x17a   :  { %v613_v12 = vadd.f32 %v612_v20, %v571_v19  ;;  %v582_v20 = vmul.f32 %v1828_v48, %v1828_v48 }
 0x17c   :  { %v614_v14 = vadd.f32 %v613_v12, %v572_v27  ;;  %v583_v12 = vmul.f32 %v1831_v51, %v1831_v51 }
 0x17e   :  { %v615_v21 = vadd.f32 %v614_v14, %v573_v18  ;;  %v584_v14 = vmul.f32 %v1834_v46, %v1834_v46 }
 0x180   :  { %v616_v28 = vadd.f32 %v615_v21, %v574_v16  ;;  %v585_v21 = vmul.f32 %v1837_v50, %v1837_v50 }
 0x182   :  { %v617_v32 = vadd.f32 %v616_v28, %v575_v22  ;;  %v586_v28 = vmul.f32 %v1840_v60, %v1840_v60 }
 0x184   :  { %v618_v40 = vadd.f32 %v617_v32, %v576_v30  ;;  %v587_v32 = vmul.f32 %v1843_v63, %v1843_v63 }
 0x186   :  { %v619_v44 = vadd.f32 %v618_v40, %v577_v37  ;;  %v589_v40 = vmul.f32 %v1849_v62, %v1849_v62 }
 0x188   :  { %v620_v8 = vadd.f32 %v619_v44, %v578_v42  ;;  %v588_v42 = vmul.f32 %v1846_v58, %v1846_v58 }
 0x18a   :  { %v621_v6 = vadd.f32 %v620_v8, %v579_v49  ;;  %v631_v8 = vsel %vm493_vm1, %v589_v40, 0.0 }
 0x18c   :  { %v622_v19 = vadd.f32 %v621_v6, %v580_v11 }
 0x18e   :  { %v623_v27 = vadd.f32 %v622_v19, %v581_v10 }
 0x190   :  { %v624_v18 = vadd.f32 %v623_v27, %v582_v20 }
 0x192   :  { %v625_v16 = vadd.f32 %v624_v18, %v583_v12 }
 0x194   :  { %v626_v22 = vadd.f32 %v625_v16, %v584_v14 }
 0x196   :  { %v627_v30 = vadd.f32 %v626_v22, %v585_v21 }
 0x198   :  { %v628_v37 = vadd.f32 %v627_v30, %v586_v28 }
 0x19a   :  { %v629_v44 = vadd.f32 %v628_v37, %v587_v32 }
 0x19c   :  { %v630_v49 = vadd.f32 %v629_v44, %v588_v42 }
 0x19e   :  { %v632_v11 = vadd.f32 %v631_v8, %v630_v49 }
 0x1a0   :  { %v633_v6 = vrot.slane %v632_v11, 4 }
 0x1a2   :  { %v634_v10 = vadd.f32 %v633_v6, %v632_v11 }
 0x1a4   :  { %v635_v19 = vrot.slane %v634_v10, 2 }
 0x1a6   :  { %v636_v20 = vadd.f32 %v635_v19, %v634_v10 }
 0x1a8   :  { %v637_v27 = vrot.slane %v636_v20, 1 }
 0x1aa   :  { %v638_v12 = vadd.f32 %v637_v27, %v636_v20 }
 0x1ac   :  { %v639_v18 = vmul.f32 0.00295858, %v638_v12 }
 0x1ae   :  { %v640_v14 = vadd.f32 1e-05, %v639_v18 }
 0x1b0   :  { %1486 = vrsqrt.f32 %v640_v14 }
 0x1ba   :  { %v1487_v16 = vpop.eup %1486 }
 0x1bb   :  { %v1939_v21 = vmul.f32 %v1487_v16, %v1804_v5  ;;  %v1942_v22 = vmul.f32 %v1487_v16, %v1807_v15  ;;  %v1945_v28 = vmul.f32 %v1487_v16, %v1810_v13  ;;  %v1948_v30 = vmul.f32 %v1487_v16, %v1813_v17 }
 0x1bc   :  { %v1951_v32 = vmul.f32 %v1487_v16, %v1816_v36  ;;  %v1954_v37 = vmul.f32 %v1487_v16, %v1819_v39  ;;  %v1957_v40 = vmul.f32 %v1487_v16, %v1822_v34  ;;  %v1960_v5 = vmul.f32 %v1487_v16, %v1825_v38 }
 0x1bd   :  { %v1963_v15 = vmul.f32 %v1487_v16, %v1828_v48  ;;  %v1966_v13 = vmul.f32 %v1487_v16, %v1831_v51  ;;  %v1969_v17 = vmul.f32 %v1487_v16, %v1834_v46  ;;  %v1972_v36 = vmul.f32 %v1487_v16, %v1837_v50 }
 0x1be   :  { %v1975_v39 = vmul.f32 %v1487_v16, %v1840_v60  ;;  %v1978_v34 = vmul.f32 %v1487_v16, %v1843_v63  ;;  %v1981_v38 = vmul.f32 %v1487_v16, %v1846_v58  ;;  %v1984_v48 = vmul.f32 %v1487_v16, %v1849_v62 }
 0x1bf   :  { %v642_v51 = vmul.f32 %v1487_v16, %v1726_v52  ;;  %v643_v46 = vmul.f32 %v1487_v16, %v1729_v54  ;;  %v644_v42 = vmul.f32 %v1487_v16, %v1732_v56  ;;  %v645_v50 = vmul.f32 %v1487_v16, %v1735_v61 }
 0x1c0   :  { %2512 = vst [vmem:[#allocation2_spill] sm:$0xff] %v1984_v48  ;;  %v646_v60 = vmul.f32 %v1487_v16, %v1738_v0  ;;  %v647_v44 = vmul.f32 %v1487_v16, %v1741_v2  ;;  %v648_v63 = vmul.f32 %v1487_v16, %v1744_v4  ;;  %v649_v58 = vmul.f32 %v1487_v16, %v1747_v24  ;;  %v1179_v4 = vld [vmem:[%s2497_s2] ss:$0 sm:$0xff] }
 0x1c1   :  { %v650_v49 = vmul.f32 %v1487_v16, %v1750_v26  ;;  %v651_v62 = vmul.f32 %v1487_v16, %v1753_v23  ;;  %v652_v52 = vmul.f32 %v1487_v16, %v1756_v25  ;;  %v653_v54 = vmul.f32 %v1487_v16, %v1759_v31 }
 0x1c2   :  { %v654_v56 = vmul.f32 %v1487_v16, %v1762_v35  ;;  %v655_v61 = vmul.f32 %v1487_v16, %v1765_v29  ;;  %v656_v0 = vmul.f32 %v1487_v16, %v1768_v33  ;;  %v657_v2 = vmul.f32 %v1487_v16, %v1771_v43 }
 0x1c3   :  { %v658_v24 = vmul.f32 %v1487_v16, %v1774_v47  ;;  %v659_v26 = vmul.f32 %v1487_v16, %v1777_v41  ;;  %v660_v23 = vmul.f32 %v1487_v16, %v1780_v45  ;;  %v661_v25 = vmul.f32 %v1487_v16, %v1783_v55 }
 0x1c4   :  { %v662_v31 = vmul.f32 %v1487_v16, %v1785_v59  ;;  %v663_v35 = vmul.f32 %v1487_v16, %v1787_v9  ;;  %v664_v29 = vmul.f32 %v1487_v16, %v1790_v53  ;;  %v665_v33 = vmul.f32 %v1487_v16, %v1792_v57 }
 0x1c5   :  { %v666_v43 = vmul.f32 %v1487_v16, %v1795_v3  ;;  %v667_v8 = vmul.f32 %v1487_v16, %v1798_v7  ;;  %v668_v47 = vmul.f32 %v1487_v16, %v1801_v1  ;;  %v692_v11 = vmul.f32 %v1179_v4, %v642_v51 }
 0x1c6   :  { %v693_v41 = vmul.f32 %v1179_v4, %v643_v46  ;;  %v694_v6 = vmul.f32 %v1179_v4, %v644_v42  ;;  %v695_v45 = vmul.f32 %v1179_v4, %v645_v50  ;;  %v696_v10 = vmul.f32 %v1179_v4, %v646_v60 }
 0x1c7   :  { %v697_v55 = vmul.f32 %v1179_v4, %v647_v44  ;;  %v698_v19 = vmul.f32 %v1179_v4, %v648_v63  ;;  %v699_v59 = vmul.f32 %v1179_v4, %v649_v58  ;;  %v700_v20 = vmul.f32 %v1179_v4, %v650_v49 }
 0x1c8   :  { %v701_v9 = vmul.f32 %v1179_v4, %v651_v62  ;;  %v702_v27 = vmul.f32 %v1179_v4, %v652_v52  ;;  %v703_v53 = vmul.f32 %v1179_v4, %v653_v54  ;;  %v704_v12 = vmul.f32 %v1179_v4, %v654_v56  ;;  %v2025_v56 = vld [vmem:[%s2498_s3] ss:$0 sm:$0xff] }
 0x1c9   :  { %v705_v57 = vmul.f32 %v1179_v4, %v655_v61  ;;  %v706_v18 = vmul.f32 %v1179_v4, %v656_v0  ;;  %v707_v3 = vmul.f32 %v1179_v4, %v657_v2  ;;  %v708_v14 = vmul.f32 %v1179_v4, %v658_v24  ;;  %v2513_v24 = vld [vmem:[#allocation2_spill] sm:$0xff] }
 0x1ca   :  { %v709_v7 = vmul.f32 %v1179_v4, %v659_v26  ;;  %v710_v48 = vmul.f32 %v1179_v4, %v660_v23  ;;  %v711_v1 = vmul.f32 %v1179_v4, %v661_v25  ;;  %v712_v16 = vmul.f32 %v1179_v4, %v662_v31 }
 0x1cb   :  { %v713_v51 = vmul.f32 %v1179_v4, %v663_v35  ;;  %v714_v46 = vmul.f32 %v1179_v4, %v664_v29  ;;  %v715_v42 = vmul.f32 %v1179_v4, %v665_v33  ;;  %v716_v50 = vmul.f32 %v1179_v4, %v666_v43 }
 0x1cc   :  { %v717_v60 = vmul.f32 %v1179_v4, %v667_v8  ;;  %v718_v44 = vmul.f32 %v1179_v4, %v668_v47  ;;  %v719_v63 = vmul.f32 %v1179_v4, %v1939_v21  ;;  %v720_v58 = vmul.f32 %v1179_v4, %v1942_v22 }
 0x1cd   :  { %v721_v49 = vmul.f32 %v1179_v4, %v1945_v28  ;;  %v722_v62 = vmul.f32 %v1179_v4, %v1948_v30  ;;  %v723_v52 = vmul.f32 %v1179_v4, %v1951_v32  ;;  %v724_v54 = vmul.f32 %v1179_v4, %v1954_v37 }
 0x1ce   :  { %v725_v61 = vmul.f32 %v1179_v4, %v1957_v40  ;;  %v726_v0 = vmul.f32 %v1179_v4, %v1960_v5  ;;  %v727_v21 = vmul.f32 %v1179_v4, %v1963_v15  ;;  %v728_v22 = vmul.f32 %v1179_v4, %v1966_v13 }
 0x1cf   :  { %v729_v28 = vmul.f32 %v1179_v4, %v1969_v17  ;;  %v730_v30 = vmul.f32 %v1179_v4, %v1972_v36  ;;  %v731_v32 = vmul.f32 %v1179_v4, %v1975_v39  ;;  %v732_v37 = vmul.f32 %v1179_v4, %v1978_v34 }
 0x1d0   :  { %v733_v2 = vmul.f32 %v1179_v4, %v1981_v38  ;;  %v734_v26 = vmul.f32 %v1179_v4, %v2513_v24  ;;  %v2038_v40 = vadd.f32 %v2025_v56, %v692_v11  ;;  %v2041_v5 = vadd.f32 %v2025_v56, %v693_v41 }
 0x1d1   :  { %v2044_v15 = vadd.f32 %v2025_v56, %v694_v6  ;;  %v2047_v13 = vadd.f32 %v2025_v56, %v695_v45  ;;  %v2050_v17 = vadd.f32 %v2025_v56, %v696_v10  ;;  %v2053_v36 = vadd.f32 %v2025_v56, %v697_v55 }
 0x1d2   :  { %v2056_v39 = vadd.f32 %v2025_v56, %v698_v19  ;;  %v2059_v34 = vadd.f32 %v2025_v56, %v699_v59  ;;  %v2062_v38 = vadd.f32 %v2025_v56, %v700_v20  ;;  %v2065_v4 = vadd.f32 %v2025_v56, %v701_v9 }
 0x1d3   :  { %v2068_v23 = vadd.f32 %v2025_v56, %v702_v27  ;;  %v2071_v25 = vadd.f32 %v2025_v56, %v703_v53  ;;  %v2074_v31 = vadd.f32 %v2025_v56, %v704_v12  ;;  %v2077_v35 = vadd.f32 %v2025_v56, %v705_v57 }
 0x1d4   :  { %v2080_v29 = vadd.f32 %v2025_v56, %v706_v18  ;;  %v2083_v33 = vadd.f32 %v2025_v56, %v707_v3  ;;  %v2086_v43 = vadd.f32 %v2025_v56, %v708_v14  ;;  %v2089_v8 = vadd.f32 %v2025_v56, %v709_v7 }
 0x1d5   :  { %v2092_v47 = vadd.f32 %v2025_v56, %v710_v48  ;;  %v2095_v11 = vadd.f32 %v2025_v56, %v711_v1  ;;  %v2098_v41 = vadd.f32 %v2025_v56, %v712_v16  ;;  %v2101_v6 = vadd.f32 %v2025_v56, %v713_v51 }
 0x1d6   :  { %v2104_v45 = vadd.f32 %v2025_v56, %v714_v46  ;;  %v2107_v10 = vadd.f32 %v2025_v56, %v715_v42  ;;  %v2110_v55 = vadd.f32 %v2025_v56, %v716_v50  ;;  %v2113_v48 = vadd.f32 %v2025_v56, %v717_v60 }
 0x1d7   :  { %v2116_v19 = vadd.f32 %v2025_v56, %v718_v44  ;;  %v2119_v59 = vadd.f32 %v2025_v56, %v719_v63  ;;  %v2122_v20 = vadd.f32 %v2025_v56, %v720_v58  ;;  %v2125_v9 = vadd.f32 %v2025_v56, %v721_v49 }
 0x1d8   :  { %v2128_v27 = vadd.f32 %v2025_v56, %v722_v62  ;;  %v2131_v53 = vadd.f32 %v2025_v56, %v723_v52  ;;  %v2134_v12 = vadd.f32 %v2025_v56, %v724_v54  ;;  %v2137_v57 = vadd.f32 %v2025_v56, %v725_v61 }
 0x1d9   :  { %2514 = vst [vmem:[#allocation2_spill] sm:$0xff] %v2125_v9  ;;  %v2140_v18 = vadd.f32 %v2025_v56, %v726_v0  ;;  %v2143_v3 = vadd.f32 %v2025_v56, %v727_v21  ;;  %v2146_v14 = vadd.f32 %v2025_v56, %v728_v22  ;;  %v2149_v7 = vadd.f32 %v2025_v56, %v729_v28 }
 0x1da   :  { %2515 = vst [vmem:[#allocation3_spill] sm:$0xff] %v2128_v27  ;;  %2516 = vst [vmem:[#allocation4_spill] sm:$0xff] %v2131_v53  ;;  %v2152_v1 = vadd.f32 %v2025_v56, %v730_v30  ;;  %v2155_v16 = vadd.f32 %v2025_v56, %v731_v32  ;;  %v2158_v51 = vadd.f32 %v2025_v56, %v732_v37  ;;  %vm785_vm2 = vcmp.gt.f32.partialorder %v2038_v40, 0.0 }
 0x1db   :  { %2517 = vst [vmem:[#allocation5_spill] sm:$0xff] %v2134_v12  ;;  %2518 = vst [vmem:[#allocation6_spill] sm:$0xff] %v2143_v3  ;;  %vm786_vm3 = vcmp.gt.f32.partialorder %v2041_v5, 0.0  ;;  %vm787_vm4 = vcmp.gt.f32.partialorder %v2044_v15, 0.0  ;;  %vm788_vm5 = vcmp.gt.f32.partialorder %v2047_v13, 0.0  ;;  %vm789_vm6 = vcmp.gt.f32.partialorder %v2050_v17, 0.0 }
 0x1dc   :  { %2519 = vst [vmem:[#allocation7_spill] sm:$0xff] %v2152_v1  ;;  %vm790_vm7 = vcmp.gt.f32.partialorder %v2053_v36, 0.0  ;;  %vm791_vm8 = vcmp.gt.f32.partialorder %v2056_v39, 0.0  ;;  %vm792_vm9 = vcmp.gt.f32.partialorder %v2059_v34, 0.0  ;;  %vm793_vm10 = vcmp.gt.f32.partialorder %v2062_v38, 0.0 }
 0x1dd   :  { %v2170_v46 = vadd.f32 %v2025_v56, %v733_v2  ;;  %vm794_vm11 = vcmp.gt.f32.partialorder %v2065_v4, 0.0  ;;  %v828_v42 = vmul.f32 0.2, %v2038_v40  ;;  %v829_v50 = vmul.f32 0.2, %v2041_v5 }
 0x1de   :  { %v830_v60 = vmul.f32 0.2, %v2044_v15  ;;  %v2177_v44 = vadd.f32 %v2025_v56, %v734_v26  ;;  %vm795_vm12 = vcmp.gt.f32.partialorder %v2068_v23, 0.0  ;;  %v831_v63 = vmul.f32 0.2, %v2047_v13 }
 0x1df   :  { %v832_v58 = vmul.f32 0.2, %v2050_v17  ;;  %v833_v49 = vmul.f32 0.2, %v2053_v36  ;;  %vm796_vm13 = vcmp.gt.f32.partialorder %v2071_v25, 0.0  ;;  %v2192_v56 = vsel %vm785_vm2, %v2038_v40, %v828_v42 }
 0x1e0   :  { %v834_v62 = vmul.f32 0.2, %v2056_v39  ;;  %v835_v52 = vmul.f32 0.2, %v2059_v34  ;;  %v2187_v54 = vmul.f32 0.2, %v2062_v38  ;;  %v2209_v22 = vsel %vm786_vm3, %v2041_v5, %v829_v50 }
 0x1e1   :  { %2520 = vst [vmem:[#allocation8_spill] sm:$0xff] %v2192_v56  ;;  %vm797_vm14 = vcmp.gt.f32.partialorder %v2074_v31, 0.0  ;;  %v2198_v61 = vmul.f32 0.2, %v2065_v4  ;;  %v2201_v0 = vmul.f32 0.2, %v2068_v23  ;;  %v2227_v37 = vsel %vm787_vm4, %v2044_v15, %v830_v60 }
 0x1e2   :  { %v2204_v21 = vmul.f32 0.2, %v2071_v25  ;;  %2521 = vst [vmem:[#allocation9_spill] sm:$0xff] %v2209_v22  ;;  %vm800_vm1 = vcmp.gt.f32.partialorder %v2083_v33, 0.0  ;;  %v2216_v28 = vmul.f32 0.2, %v2074_v31  ;;  %v2239_v40 = vsel %vm788_vm5, %v2047_v13, %v831_v63 }
 0x1e3   :  { %v2219_v30 = vmul.f32 0.2, %v2077_v35  ;;  %v2222_v32 = vmul.f32 0.2, %v2080_v29  ;;  %2522 = vst [vmem:[#allocation10_spill] sm:$0xff] %v2227_v37  ;;  %vm807_vm2 = vcmp.gt.f32.partialorder %v2104_v45, 0.0  ;;  %v2251_v50 = vsel %vm789_vm6, %v2050_v17, %v832_v58 }
 0x1e4   :  { %v843_v2 = vmul.f32 0.2, %v2083_v33  ;;  %v844_v24 = vmul.f32 0.2, %v2086_v43  ;;  %v845_v26 = vmul.f32 0.2, %v2089_v8  ;;  %v2275_v37 = vsel %vm791_vm8, %v2056_v39, %v834_v62 }
 0x1e5   :  { %2523 = vst [vmem:[#allocation11_spill] sm:$0xff] %v2239_v40  ;;  %vm811_vm15 = vcmp.gt.f32.partialorder %v2116_v19, 0.0  ;;  %v846_v5 = vmul.f32 0.2, %v2092_v47  ;;  %v847_v15 = vmul.f32 0.2, %v2095_v11  ;;  %v2263_v40 = vsel %vm790_vm7, %v2053_v36, %v833_v49 }
 0x1e6   :  { %v848_v42 = vmul.f32 0.2, %v2098_v41  ;;  %2524 = vst [vmem:[#allocation12_spill] sm:$0xff] %v2251_v50  ;;  %vm815_vm0 = vcmp.gt.f32.partialorder %v2128_v27, 0.0  ;;  %v849_v13 = vmul.f32 0.2, %v2101_v6  ;;  %v2287_v22 = vsel %vm792_vm9, %v2059_v34, %v835_v52 }
 0x1e7   :  { %v850_v60 = vmul.f32 0.2, %v2104_v45  ;;  %v851_v63 = vmul.f32 0.2, %v2107_v10  ;;  %2525 = vst [vmem:[#allocation13_spill] sm:$0xff] %v2263_v40  ;;  %vm819_vm3 = vcmp.gt.f32.partialorder %v2140_v18, 0.0  ;;  %v2300_v34 = vsel %vm793_vm10, %v2062_v38, %v2187_v54 }
 0x1e8   :  { %v852_v17 = vmul.f32 0.2, %v2110_v55  ;;  %v853_v58 = vmul.f32 0.2, %v2113_v48  ;;  %v854_v50 = vmul.f32 0.2, %v2116_v19  ;;  %v881_v38 = vsel %vm795_vm12, %v2068_v23, %v2201_v0 }
 0x1e9   :  { %2526 = vst [vmem:[#allocation14_spill] sm:$0xff] %v2275_v37  ;;  %vm823_vm4 = vcmp.gt.f32.partialorder %v2152_v1, 0.0  ;;  %v855_v36 = vmul.f32 0.2, %v2119_v59  ;;  %v856_v49 = vmul.f32 0.2, %v2122_v20 }
 0x1ea   :  { %v857_v40 = vmul.f32 0.2, %v2125_v9  ;;  %2527 = vst [vmem:[#allocation15_spill] sm:$0xff] %v2287_v22  ;;  %vm824_vm8 = vcmp.gt.f32.partialorder %v2155_v16, 0.0  ;;  %vm825_vm7 = vcmp.gt.f32.partialorder %v2158_v51, 0.0  ;;  %vm826_vm6 = vcmp.gt.f32.partialorder %v2170_v46, 0.0 }
 0x1eb   :  { %vm827_vm5 = vcmp.gt.f32.partialorder %v2177_v44, 0.0  ;;  %v858_v39 = vmul.f32 0.2, %v2128_v27  ;;  %v859_v62 = vmul.f32 0.2, %v2131_v53  ;;  %2528 = vst [vmem:[#allocation16_spill] sm:$0xff] %v2300_v34  ;;  %v880_v27 = vsel %vm794_vm11, %v2065_v4, %v2198_v61 }
 0x1ec   :  { %v860_v37 = vmul.f32 0.2, %v2134_v12  ;;  %v861_v52 = vmul.f32 0.2, %v2137_v57  ;;  %v862_v22 = vmul.f32 0.2, %v2140_v18  ;;  %v882_v4 = vsel %vm796_vm13, %v2071_v25, %v2204_v21 }
 0x1ed   :  { %v863_v56 = vmul.f32 0.2, %v2143_v3  ;;  %v864_v53 = vmul.f32 0.2, %v2146_v14  ;;  %v865_v12 = vmul.f32 0.2, %v2149_v7  ;;  %v886_v25 = vsel %vm800_vm1, %v2083_v33, %v843_v2 }
 0x1ee   :  { %v866_v9 = vmul.f32 0.2, %v2152_v1  ;;  %v867_v54 = vmul.f32 0.2, %v2155_v16  ;;  %v868_v34 = vmul.f32 0.2, %v2158_v51  ;;  %v883_v1 = vsel %vm797_vm14, %v2074_v31, %v2216_v28 }
 0x1ef   :  { %v869_v3 = vmul.f32 0.2, %v2170_v46  ;;  %v870_v61 = vmul.f32 0.2, %v2177_v44  ;;  %vm2529_vm9 = vcmp.gt.f32.partialorder %v2077_v35, 0.0  ;;  %vm2530_vm10 = vcmp.gt.f32.partialorder %v2080_v29, 0.0 }
 0x1f0   :  { %v884_v23 = vsel %vm2529_vm9, %v2077_v35, %v2219_v30  ;;  %v885_v0 = vsel %vm2530_vm10, %v2080_v29, %v2222_v32  ;;  %vm2531_vm11 = vcmp.gt.f32.partialorder %v2086_v43, 0.0  ;;  %vm2532_vm12 = vcmp.gt.f32.partialorder %v2089_v8, 0.0  ;;  %v2542_v28 = vld [vmem:[#allocation2_spill] sm:$0xff]  ;;  %v2544_v30 = vld [vmem:[#allocation3_spill] sm:$0xff]  ;;  %v2545_v32 = vld [vmem:[#allocation4_spill] sm:$0xff] }
 0x1f1   :  { %v887_v21 = vsel %vm2531_vm11, %v2086_v43, %v844_v24  ;;  %v888_v31 = vsel %vm2532_vm12, %v2089_v8, %v845_v26  ;;  %vm2533_vm13 = vcmp.gt.f32.partialorder %v2092_v47, 0.0  ;;  %vm2534_vm14 = vcmp.gt.f32.partialorder %v2095_v11, 0.0  ;;  %v2547_v2 = vld [vmem:[#allocation5_spill] sm:$0xff]  ;;  %v2550_v26 = vld [vmem:[#allocation6_spill] sm:$0xff] }
 0x1f2   :  { %v889_v35 = vsel %vm2533_vm13, %v2092_v47, %v846_v5  ;;  %v890_v29 = vsel %vm2534_vm14, %v2095_v11, %v847_v15  ;;  %vm2535_vm9 = vcmp.gt.f32.partialorder %v2098_v41, 0.0  ;;  %vm2536_vm1 = vcmp.gt.f32.partialorder %v2101_v6, 0.0  ;;  %v2554_v15 = vld [vmem:[#allocation7_spill] sm:$0xff] }
 0x1f3   :  { %v891_v33 = vsel %vm2535_vm9, %v2098_v41, %v848_v42  ;;  %v892_v43 = vsel %vm2536_vm1, %v2101_v6, %v849_v13  ;;  %v893_v8 = vsel %vm807_vm2, %v2104_v45, %v850_v60  ;;  %vm2537_vm10 = vcmp.gt.f32.partialorder %v2107_v10, 0.0  ;;  %v2557_v42 = vld [vmem:[#allocation10_spill] sm:$0xff]  ;;  %v2560_v60 = vld [vmem:[#allocation13_spill] sm:$0xff] }
 0x1f4   :  { %v894_v47 = vsel %vm2537_vm10, %v2107_v10, %v851_v63  ;;  %vm2538_vm11 = vcmp.gt.f32.partialorder %v2110_v55, 0.0  ;;  %vm2539_vm12 = vcmp.gt.f32.partialorder %v2113_v48, 0.0  ;;  %v897_v6 = vsel %vm811_vm15, %v2116_v19, %v854_v50  ;;  %v2558_v50 = vld [vmem:[#allocation11_spill] sm:$0xff] }
 0x1f5   :  { %v895_v11 = vsel %vm2538_vm11, %v2110_v55, %v852_v17  ;;  %v896_v41 = vsel %vm2539_vm12, %v2113_v48, %v853_v58  ;;  %vm2540_vm13 = vcmp.gt.f32.partialorder %v2119_v59, 0.0  ;;  %vm2541_vm2 = vcmp.gt.f32.partialorder %v2122_v20, 0.0  ;;  %v2561_v17 = vld [vmem:[#allocation14_spill] sm:$0xff] }
 0x1f6   :  { %v898_v45 = vsel %vm2540_vm13, %v2119_v59, %v855_v36  ;;  %v899_v10 = vsel %vm2541_vm2, %v2122_v20, %v856_v49  ;;  %vm2543_vm14 = vcmp.gt.f32.partialorder %v2542_v28, 0.0  ;;  %v901_v48 = vsel %vm815_vm0, %v2544_v30, %v858_v39  ;;  %v2563_v36 = vld [vmem:[#allocation16_spill] sm:$0xff] }
 0x1f7   :  { %v900_v55 = vsel %vm2543_vm14, %v2542_v28, %v857_v40  ;;  %vm2546_vm9 = vcmp.gt.f32.partialorder %v2545_v32, 0.0  ;;  %vm2548_vm15 = vcmp.gt.f32.partialorder %v2547_v2, 0.0  ;;  %vm2549_vm1 = vcmp.gt.f32.partialorder %v2137_v57, 0.0 }
 0x1f8   :  { %v902_v19 = vsel %vm2546_vm9, %v2545_v32, %v859_v62  ;;  %v903_v59 = vsel %vm2548_vm15, %v2547_v2, %v860_v37  ;;  %v904_v20 = vsel %vm2549_vm1, %v2137_v57, %v861_v52  ;;  %v905_v24 = vsel %vm819_vm3, %v2140_v18, %v862_v22  ;;  %v2556_v22 = vld [vmem:[#allocation9_spill] sm:$0xff] }
 0x1f9   :  { %vm2551_vm10 = vcmp.gt.f32.partialorder %v2550_v26, 0.0  ;;  %vm2552_vm0 = vcmp.gt.f32.partialorder %v2146_v14, 0.0  ;;  %vm2553_vm11 = vcmp.gt.f32.partialorder %v2149_v7, 0.0  ;;  %v909_v57 = vsel %vm823_vm4, %v2554_v15, %v866_v9 }
 0x1fa   :  { %v906_v40 = vsel %vm2551_vm10, %v2550_v26, %v863_v56  ;;  %v907_v5 = vsel %vm2552_vm0, %v2146_v14, %v864_v53  ;;  %v908_v37 = vsel %vm2553_vm11, %v2149_v7, %v865_v12  ;;  %v910_v18 = vsel %vm824_vm8, %v2155_v16, %v867_v54  ;;  %v2555_v7 = vld [vmem:[#allocation8_spill] sm:$0xff] }
 0x1fb   :  { %v911_v56 = vsel %vm825_vm7, %v2158_v51, %v868_v34  ;;  %v912_v53 = vsel %vm826_vm6, %v2170_v46, %v869_v3  ;;  %v913_v12 = vsel %vm827_vm5, %v2177_v44, %v870_v61  ;;  %v1270_v9 = vpack.c.bf16 %v2556_v22, %v2555_v7  ;;  %v2559_v16 = vld [vmem:[#allocation12_spill] sm:$0xff]  ;;  %v2562_v51 = vld [vmem:[#allocation15_spill] sm:$0xff] }
 0x1fc   :  { %v1266_v14 = vpack.c.bf16 %v913_v12, %v913_v12  ;;  %v1275_v13 = vpack.c.bf16 %v2558_v50, %v2557_v42  ;;  %v1280_v63 = vpack.c.bf16 %v2560_v60, %v2559_v16  ;;  %v1285_v58 = vpack.c.bf16 %v2562_v51, %v2561_v17 }
 0x1fd   :  { %v1290_v49 = vpack.c.bf16 %v880_v27, %v2563_v36  ;;  %v1295_v3 = vpack.c.bf16 %v882_v4, %v881_v38  ;;  %v1300_v46 = vpack.c.bf16 %v884_v23, %v883_v1  ;;  %1271 = vst [vmem:[%s2499_s4] sm:$0xff] %v1270_v9   ;;  %v1305_v44 = vpack.c.bf16 %v886_v25, %v885_v0 }
 0x1fe   :  { %1372 = vst [vmem:[%s2499_s4 + $0x8] sm:$0xff] %v1275_v13   ;;  %1373 = vst [vmem:[%s2499_s4 + $0x10] sm:$0xff] %v1280_v63   ;;  %v1310_v39 = vpack.c.bf16 %v888_v31, %v887_v21  ;;  %v1315_v62 = vpack.c.bf16 %v890_v29, %v889_v35  ;;  %v1320_v34 = vpack.c.bf16 %v892_v43, %v891_v33 }
 0x1ff   :  { %1129 = vst [vmem:[%s2499_s4 + $0xa8] sm:$0x1] %v1266_v14  ;;  %1374 = vst [vmem:[%s2499_s4 + $0x18] sm:$0xff] %v1285_v58   ;;  %v1325_v27 = vpack.c.bf16 %v894_v47, %v893_v8  ;;  %v1330_v1 = vpack.c.bf16 %v896_v41, %v895_v11  ;;  %v1335_v52 = vpack.c.bf16 %v898_v45, %v897_v6 }
 0x200   :  { %1375 = vst [vmem:[%s2499_s4 + $0x20] sm:$0xff] %v1290_v49   ;;  %1376 = vst [vmem:[%s2499_s4 + $0x28] sm:$0xff] %v1295_v3   ;;  %v1340_v38 = vpack.c.bf16 %v900_v55, %v899_v10  ;;  %v1345_v54 = vpack.c.bf16 %v902_v19, %v901_v48  ;;  %v1350_v4 = vpack.c.bf16 %v904_v20, %v903_v59 }
 0x201   :  { %1377 = vst [vmem:[%s2499_s4 + $0x30] sm:$0xff] %v1300_v46   ;;  %1378 = vst [vmem:[%s2499_s4 + $0x38] sm:$0xff] %v1305_v44   ;;  %v1355_v61 = vpack.c.bf16 %v906_v40, %v905_v24  ;;  %v1360_v23 = vpack.c.bf16 %v908_v37, %v907_v5  ;;  %v1365_v0 = vpack.c.bf16 %v910_v18, %v909_v57 }
 0x202   :  { %1379 = vst [vmem:[%s2499_s4 + $0x40] sm:$0xff] %v1310_v39   ;;  %1380 = vst [vmem:[%s2499_s4 + $0x48] sm:$0xff] %v1315_v62   ;;  %v1370_v25 = vpack.c.bf16 %v912_v53, %v911_v56 }
 0x203   :  { %1381 = vst [vmem:[%s2499_s4 + $0x50] sm:$0xff] %v1320_v34   ;;  %1382 = vst [vmem:[%s2499_s4 + $0x58] sm:$0xff] %v1325_v27  }
 0x204   :  { %1383 = vst [vmem:[%s2499_s4 + $0x60] sm:$0xff] %v1330_v1   ;;  %1384 = vst [vmem:[%s2499_s4 + $0x68] sm:$0xff] %v1335_v52  }
 0x205   :  { %1385 = vst [vmem:[%s2499_s4 + $0x70] sm:$0xff] %v1340_v38   ;;  %1386 = vst [vmem:[%s2499_s4 + $0x78] sm:$0xff] %v1345_v54  }
 0x206   :  { %1387 = vst [vmem:[%s2499_s4 + $0x80] sm:$0xff] %v1350_v4   ;;  %1388 = vst [vmem:[%s2499_s4 + $0x88] sm:$0xff] %v1355_v61  }
 0x207   :  { %1389 = vst [vmem:[%s2499_s4 + $0x90] sm:$0xff] %v1360_v23   ;;  %1390 = vst [vmem:[%s2499_s4 + $0x98] sm:$0xff] %v1365_v0  }
 0x208   :  { %1391 = vst [vmem:[%s2499_s4 + $0xa0] sm:$0xff] %v1370_v25  }

// kernel: discriminator_forward.4
= control target key start
LH: loop header
LB: loop body
LE: loop exit
PB: predicated region body
PF: predicated region fallthrough
CT: control target
= control target key end

     0   :  { %vm495_vm0 = vcmask 1041408   ;;  %s1032_s1 = inlined_call_operand.vmem [shape: bf16[512,128], index: 1, kind: input, shape index: {}]   ;;  %s1033_s0 = inlined_call_operand.vmem [shape: bf16[50,512], index: 0, kind: input, shape index: {}]   ;;  %s1034_s2 = inlined_call_operand.vmem [shape: f32[1,128], index: 2, kind: input, shape index: {}]   ;;  %s1035_s3 = inlined_call_operand.vmem [shape: f32[1,128], index: 3, kind: input, shape index: {}]   ;;  %s1036_s4 = inlined_call_operand.vmem [shape: bf16[50,128], index: 4, kind: output, shape index: {}]  }
   0x1   :  { %v793_v0 = vld [vmem:[%s1032_s1 + $0x40] sm:$0xff]   ;;  %v797_v4 = vld [vmem:[%s1032_s1 + $0x48] sm:$0xff]   ;;  %v801_v8 = vld [vmem:[%s1032_s1 + $0x50] sm:$0xff]  }
   0x2   :  { %v794_v1 = vld [vmem:[%s1032_s1 + $0xc0] sm:$0xff]   ;;  %713 = vmatprep.subr.bf16.mxu0 %v793_v0  ;;  %v798_v5 = vld [vmem:[%s1032_s1 + $0xc8] sm:$0xff]   ;;  %v802_v9 = vld [vmem:[%s1032_s1 + $0xd0] sm:$0xff]  }
   0x3   :  { %v795_v2 = vld [vmem:[%s1032_s1] sm:$0xff]   ;;  %753 = vmatprep.subr.bf16.mxu1 %v794_v1  ;;  %v799_v6 = vld [vmem:[%s1032_s1 + $0x8] sm:$0xff]   ;;  %v803_v10 = vld [vmem:[%s1032_s1 + $0x10] sm:$0xff]  }
   0x4   :  { %v796_v3 = vld [vmem:[%s1032_s1 + $0x80] sm:$0xff]   ;;  %714 = vmatpush3.bf16.msra.mxu0 %v795_v2  ;;  %v800_v7 = vld [vmem:[%s1032_s1 + $0x88] sm:$0xff]   ;;  %v804_v11 = vld [vmem:[%s1032_s1 + $0x90] sm:$0xff]  }
   0x5   :  { %754 = vmatpush3.bf16.msra.mxu1 %v796_v3  ;;  %715 = vmatprep.subr.bf16.mxu0 %v797_v4  ;;  %v805_v12 = vld [vmem:[%s1032_s1 + $0x58] sm:$0xff]   ;;  %v809_v16 = vld [vmem:[%s1032_s1 + $0x60] sm:$0xff]   ;;  %v813_v20 = vld [vmem:[%s1032_s1 + $0x68] sm:$0xff]  }
   0x6   :  { %755 = vmatprep.subr.bf16.mxu1 %v798_v5  ;;  %v806_v13 = vld [vmem:[%s1032_s1 + $0xd8] sm:$0xff]   ;;  %v810_v17 = vld [vmem:[%s1032_s1 + $0xe0] sm:$0xff]   ;;  %v814_v21 = vld [vmem:[%s1032_s1 + $0xe8] sm:$0xff]  }
   0x7   :  { %v807_v14 = vld [vmem:[%s1032_s1 + $0x18] sm:$0xff]   ;;  %v811_v18 = vld [vmem:[%s1032_s1 + $0x20] sm:$0xff]   ;;  %v815_v22 = vld [vmem:[%s1032_s1 + $0x28] sm:$0xff]  }
   0x8   :  { %716 = vmatpush3.bf16.msra.mxu0 %v799_v6  ;;  %v808_v15 = vld [vmem:[%s1032_s1 + $0x98] sm:$0xff]   ;;  %v812_v19 = vld [vmem:[%s1032_s1 + $0xa0] sm:$0xff]   ;;  %v816_v23 = vld [vmem:[%s1032_s1 + $0xa8] sm:$0xff]  }
   0x9   :  { %756 = vmatpush3.bf16.msra.mxu1 %v800_v7  ;;  %717 = vmatprep.subr.bf16.mxu0 %v801_v8  ;;  %v817_v24 = vld [vmem:[%s1032_s1 + $0x70] sm:$0xff]   ;;  %v821_v28 = vld [vmem:[%s1032_s1 + $0x78] sm:$0xff]   ;;  %v30_v42 = vld [vmem:[%s1033_s0 + $0x60] sm:$0x11] }
   0xa   :  { %757 = vmatprep.subr.bf16.mxu1 %v802_v9  ;;  %v818_v25 = vld [vmem:[%s1032_s1 + $0xf0] sm:$0xff]   ;;  %v822_v29 = vld [vmem:[%s1032_s1 + $0xf8] sm:$0xff]   ;;  %v31_v43 = vld [vmem:[%s1033_s0 + $0x68] sm:$0x11]  ;;  %v645_v46 = vcombine.high %v30_v42, %v30_v42  ;;  %v644_v48 = vcombine.low %v30_v42, %v30_v42 }
   0xb   :  { %v819_v26 = vld [vmem:[%s1032_s1 + $0x30] sm:$0xff]   ;;  %v823_v30 = vld [vmem:[%s1032_s1 + $0x38] sm:$0xff]   ;;  %v647_v47 = vcombine.high %v31_v43, %v31_v43  ;;  %v646_v49 = vcombine.low %v31_v43, %v31_v43 }
   0xc   :  { %718 = vmatpush3.bf16.msra.mxu0 %v803_v10  ;;  %v820_v27 = vld [vmem:[%s1032_s1 + $0xb0] sm:$0xff]   ;;  %v824_v31 = vld [vmem:[%s1032_s1 + $0xb8] sm:$0xff]  }
   0xd   :  { %758 = vmatpush3.bf16.msra.mxu1 %v804_v11  ;;  %719 = vmatprep.subr.bf16.mxu0 %v805_v12  ;;  %v825_v32 = vld [vmem:[%s1033_s0] ss:$16 sps:$4 sm:$0xff]   ;;  %v827_v33 = vld [vmem:[%s1033_s0 + $0x4] ss:$16 sps:$4 sm:$0xff]   ;;  %v828_v34 = vld [vmem:[%s1033_s0 + $0x8] ss:$16 sps:$4 sm:$0xff]  }
   0xe   :  { %759 = vmatprep.subr.bf16.mxu1 %v806_v13  ;;  %v830_v35 = vld [vmem:[%s1033_s0 + $0xc] ss:$16 sps:$4 sm:$0xff]   ;;  %394 = vmatprep.mubr.bf16.mxu0 %v827_v33  ;;  %v831_v36 = vld [vmem:[%s1033_s0 + $0x24] ss:$16 sps:$4 sm:$0xff]   ;;  %v835_v38 = vld [vmem:[%s1033_s0 + $0x20] ss:$16 sps:$4 sm:$0xff]  }
   0xf   :  { %458 = vmatprep.mubr.bf16.mxu1 %v830_v35  ;;  %v833_v37 = vld [vmem:[%s1033_s0 + $0x2c] ss:$16 sps:$4 sm:$0xff]   ;;  %v836_v39 = vld [vmem:[%s1033_s0 + $0x28] ss:$16 sps:$4 sm:$0xff]   ;;  %v837_v40 = vld [vmem:[%s1033_s0 + $0x44] ss:$16 sps:$4 sm:$0xff]  }
  0x10   :  { %720 = vmatpush3.bf16.msra.mxu0 %v807_v14  ;;  %v839_v41 = vld [vmem:[%s1033_s0 + $0x4c] ss:$16 sps:$4 sm:$0xff]   ;;  %v841_v44 = vld [vmem:[%s1033_s0 + $0x40] ss:$16 sps:$4 sm:$0xff]   ;;  %v842_v45 = vld [vmem:[%s1033_s0 + $0x48] ss:$16 sps:$4 sm:$0xff]  }
  0x11   :  { %760 = vmatpush3.bf16.msra.mxu1 %v808_v15  ;;  %721 = vmatprep.subr.bf16.mxu0 %v809_v16 }
  0x12   :  { %761 = vmatprep.subr.bf16.mxu1 %v810_v17 }
  0x14   :  { %722 = vmatpush3.bf16.msra.mxu0 %v811_v18 }
  0x15   :  { %762 = vmatpush3.bf16.msra.mxu1 %v812_v19  ;;  %723 = vmatprep.subr.bf16.mxu0 %v813_v20 }
  0x16   :  { %763 = vmatprep.subr.bf16.mxu1 %v814_v21 }
  0x18   :  { %724 = vmatpush3.bf16.msra.mxu0 %v815_v22 }
  0x19   :  { %764 = vmatpush3.bf16.msra.mxu1 %v816_v23  ;;  %725 = vmatprep.subr.bf16.mxu0 %v817_v24 }
  0x1a   :  { %765 = vmatprep.subr.bf16.mxu1 %v818_v25 }
  0x1c   :  { %726 = vmatpush3.bf16.msra.mxu0 %v819_v26 }
  0x1d   :  { %766 = vmatpush3.bf16.msra.mxu1 %v820_v27  ;;  %727 = vmatprep.subr.bf16.mxu0 %v821_v28 }
  0x1e   :  { %767 = vmatprep.subr.bf16.mxu1 %v822_v29 }
  0x20   :  { %728 = vmatpush3.bf16.msra.mxu0 %v823_v30 }
  0x21   :  { %768 = vmatpush3.bf16.msra.mxu1 %v824_v31 }
  0x23   :  { %395 = vmatmul.mubr.bf16.vlgmr.msra.gmra.mrb[0].mxu0 %v825_v32 }
  0x24   :  { %459 = vmatmul.mubr.bf16.vlgmr.msra.gmra.mrb[0].mxu1 %v828_v34  ;;  %402 = vmatprep.mubr.bf16.mxu0 %v831_v36 }
  0x25   :  { %466 = vmatprep.mubr.bf16.mxu1 %v833_v37 }
  0x2b   :  { %403 = vmatmul.mubr.bf16.gmra.mrb[4].mxu0 %v835_v38 }
  0x2c   :  { %467 = vmatmul.mubr.bf16.gmra.mrb[4].mxu1 %v836_v39  ;;  %410 = vmatprep.mubr.bf16.mxu0 %v837_v40 }
  0x2d   :  { %474 = vmatprep.mubr.bf16.mxu1 %v839_v41 }
  0x33   :  { %411 = vmatmul.mubr.bf16.gmra.mrb[8].mxu0 %v841_v44 }
  0x34   :  { %475 = vmatmul.mubr.bf16.gmra.mrb[8].mxu1 %v842_v45  ;;  %418 = vmatprep.mubr.bf16.mxu0 %v645_v46 }
  0x35   :  { %482 = vmatprep.mubr.bf16.mxu1 %v647_v47 }
  0x3b   :  { %419 = vmatmul.mubr.bf16.gmra.mrb[12].mxu0 %v644_v48 }
  0x3c   :  { %483 = vmatmul.mubr.bf16.gmra.mrb[12].mxu1 %v646_v49 }
  0xf6   :  { %v729_v50 = vpop.f32.mrb[0].mxu0 }
  0xf7   :  { %v769_v51 = vpop.f32.mrb[0].mxu1  ;;  %v730_v52 = vpop.f32.mrb[1].mxu0 }
  0xf8   :  { %v731_v53 = vadd.f32 %v730_v52, %v729_v50  ;;  %v770_v54 = vpop.f32.mrb[1].mxu1  ;;  %v732_v55 = vpop.f32.mrb[2].mxu0 }
  0xf9   :  { %v771_v56 = vadd.f32 %v770_v54, %v769_v51  ;;  %v772_v57 = vpop.f32.mrb[2].mxu1  ;;  %v733_v58 = vpop.f32.mrb[3].mxu0 }
  0xfa   :  { %v734_v59 = vadd.f32 %v733_v58, %v732_v55  ;;  %v773_v60 = vpop.f32.mrb[3].mxu1 }
  0xfb   :  { %v461_v61 = vadd.f32 %v771_v56, %v731_v53  ;;  %v774_v62 = vadd.f32 %v773_v60, %v772_v57 }
  0xfd   :  { %v464_v63 = vadd.f32 %v774_v62, %v734_v59 }
  0xfe   :  { %v735_v0 = vpop.f32.mrb[4].mxu0 }
  0xff   :  { %v490_v1 = vadd.f32 %v464_v63, %v461_v61  ;;  %v775_v2 = vpop.f32.mrb[4].mxu1  ;;  %v736_v3 = vpop.f32.mrb[5].mxu0 }
 0x100   :  { %v737_v4 = vadd.f32 %v736_v3, %v735_v0  ;;  %v776_v5 = vpop.f32.mrb[5].mxu1  ;;  %v738_v6 = vpop.f32.mrb[6].mxu0 }
 0x101   :  { %v777_v7 = vadd.f32 %v776_v5, %v775_v2  ;;  %v778_v8 = vpop.f32.mrb[6].mxu1  ;;  %v739_v9 = vpop.f32.mrb[7].mxu0 }
 0x102   :  { %v740_v10 = vadd.f32 %v739_v9, %v738_v6  ;;  %v779_v11 = vpop.f32.mrb[7].mxu1 }
 0x103   :  { %v469_v12 = vadd.f32 %v777_v7, %v737_v4  ;;  %v780_v13 = vadd.f32 %v779_v11, %v778_v8 }
 0x105   :  { %v491_v14 = vadd.f32 %v490_v1, %v469_v12  ;;  %v472_v15 = vadd.f32 %v780_v13, %v740_v10 }
 0x106   :  { %v741_v16 = vpop.f32.mrb[8].mxu0 }
 0x107   :  { %v492_v17 = vadd.f32 %v491_v14, %v472_v15  ;;  %v781_v18 = vpop.f32.mrb[8].mxu1  ;;  %v742_v19 = vpop.f32.mrb[9].mxu0 }
 0x108   :  { %v743_v20 = vadd.f32 %v742_v19, %v741_v16  ;;  %v782_v21 = vpop.f32.mrb[9].mxu1  ;;  %v744_v22 = vpop.f32.mrb[10].mxu0  ;;  %v680_v19 = vld [vmem:[%s1034_s2] ss:$0 sm:$0xff] }
 0x109   :  { %v783_v23 = vadd.f32 %v782_v21, %v781_v18  ;;  %v784_v24 = vpop.f32.mrb[10].mxu1  ;;  %v745_v25 = vpop.f32.mrb[11].mxu0 }
 0x10a   :  { %v746_v26 = vadd.f32 %v745_v25, %v744_v22  ;;  %v785_v27 = vpop.f32.mrb[11].mxu1 }
 0x10b   :  { %v477_v28 = vadd.f32 %v783_v23, %v743_v20  ;;  %v786_v29 = vadd.f32 %v785_v27, %v784_v24  ;;  %v681_v27 = vld [vmem:[%s1035_s3] ss:$0 sm:$0xff] }
 0x10d   :  { %v493_v30 = vadd.f32 %v492_v17, %v477_v28  ;;  %v480_v31 = vadd.f32 %v786_v29, %v746_v26 }
 0x10e   :  { %v747_v32 = vpop.f32.mrb[12].mxu0 }
 0x10f   :  { %v494_v33 = vadd.f32 %v493_v30, %v480_v31  ;;  %v787_v34 = vpop.f32.mrb[12].mxu1  ;;  %v748_v35 = vpop.f32.mrb[13].mxu0 }
 0x110   :  { %v749_v36 = vadd.f32 %v748_v35, %v747_v32  ;;  %v788_v37 = vpop.f32.mrb[13].mxu1  ;;  %v750_v38 = vpop.f32.mrb[14].mxu0 }
 0x111   :  { %v789_v39 = vadd.f32 %v788_v37, %v787_v34  ;;  %v790_v40 = vpop.f32.mrb[14].mxu1  ;;  %v751_v41 = vpop.f32.mrb[15].mxu0 }
 0x112   :  { %v791_v42 = vpop.f32.mrb[15].mxu1 }
 0x113   :  { %v485_v43 = vadd.f32 %v789_v39, %v749_v36 }
 0x115   :  { %v496_v44 = vsel %vm495_vm0, %v485_v43, 0.0 }
 0x116   :  { %v497_v45 = vadd.f32 %v496_v44, %v494_v33 }
 0x118   :  { %v498_v46 = vrot.slane %v497_v45, 4 }
 0x11a   :  { %v499_v47 = vadd.f32 %v498_v46, %v497_v45 }
 0x11c   :  { %v500_v48 = vrot.slane %v499_v47, 2 }
 0x11e   :  { %v501_v49 = vadd.f32 %v500_v48, %v499_v47 }
 0x120   :  { %v502_v50 = vrot.slane %v501_v49, 1 }
 0x122   :  { %v503_v51 = vadd.f32 %v502_v50, %v501_v49 }
 0x124   :  { %v505_v52 = vmul.f32 0.02, %v503_v51 }
 0x126   :  { %v506_v53 = vsub.f32 %v461_v61, %v505_v52  ;;  %v507_v54 = vsub.f32 %v464_v63, %v505_v52  ;;  %v508_v55 = vsub.f32 %v469_v12, %v505_v52  ;;  %v509_v56 = vsub.f32 %v472_v15, %v505_v52 }
 0x127   :  { %v510_v57 = vsub.f32 %v477_v28, %v505_v52  ;;  %v511_v58 = vsub.f32 %v480_v31, %v505_v52  ;;  %v512_v59 = vsub.f32 %v485_v43, %v505_v52 }
 0x128   :  { %v513_v60 = vmul.f32 %v506_v53, %v506_v53  ;;  %v514_v62 = vmul.f32 %v507_v54, %v507_v54  ;;  %v515_v0 = vmul.f32 %v508_v55, %v508_v55  ;;  %v516_v2 = vmul.f32 %v509_v56, %v509_v56 }
 0x129   :  { %v517_v4 = vmul.f32 %v510_v57, %v510_v57  ;;  %v519_v6 = vmul.f32 %v512_v59, %v512_v59  ;;  %v518_v7 = vmul.f32 %v511_v58, %v511_v58 }
 0x12a   :  { %v520_v1 = vadd.f32 %v514_v62, %v513_v60 }
 0x12b   :  { %v525_v61 = vsel %vm495_vm0, %v519_v6, 0.0 }
 0x12c   :  { %v521_v3 = vadd.f32 %v520_v1, %v515_v0 }
 0x12e   :  { %v522_v5 = vadd.f32 %v521_v3, %v516_v2 }
 0x130   :  { %v523_v8 = vadd.f32 %v522_v5, %v517_v4 }
 0x132   :  { %v524_v9 = vadd.f32 %v523_v8, %v518_v7 }
 0x134   :  { %v526_v63 = vadd.f32 %v525_v61, %v524_v9 }
 0x136   :  { %v527_v10 = vrot.slane %v526_v63, 4 }
 0x138   :  { %v528_v11 = vadd.f32 %v527_v10, %v526_v63 }
 0x13a   :  { %v529_v12 = vrot.slane %v528_v11, 2 }
 0x13c   :  { %v530_v13 = vadd.f32 %v529_v12, %v528_v11 }
 0x13e   :  { %v531_v14 = vrot.slane %v530_v13, 1 }
 0x140   :  { %v532_v15 = vadd.f32 %v531_v14, %v530_v13 }
 0x142   :  { %v533_v16 = vmul.f32 0.02, %v532_v15 }
 0x144   :  { %v534_v17 = vadd.f32 1e-05, %v533_v16 }
 0x146   :  { %847 = vrsqrt.f32 %v534_v17 }
 0x150   :  { %v848_v18 = vpop.eup %847 }
 0x151   :  { %v536_v20 = vmul.f32 %v848_v18, %v506_v53  ;;  %v537_v21 = vmul.f32 %v848_v18, %v507_v54  ;;  %v538_v22 = vmul.f32 %v848_v18, %v508_v55  ;;  %v539_v23 = vmul.f32 %v848_v18, %v509_v56 }
 0x152   :  { %v540_v24 = vmul.f32 %v848_v18, %v510_v57  ;;  %v541_v25 = vmul.f32 %v848_v18, %v511_v58  ;;  %v542_v26 = vmul.f32 %v848_v18, %v512_v59 }
 0x153   :  { %v550_v28 = vmul.f32 %v680_v19, %v536_v20  ;;  %v551_v29 = vmul.f32 %v680_v19, %v537_v21  ;;  %v552_v30 = vmul.f32 %v680_v19, %v538_v22  ;;  %v553_v31 = vmul.f32 %v680_v19, %v539_v23 }
 0x154   :  { %v554_v32 = vmul.f32 %v680_v19, %v540_v24  ;;  %v555_v33 = vmul.f32 %v680_v19, %v541_v25  ;;  %v556_v34 = vmul.f32 %v680_v19, %v542_v26 }
 0x155   :  { %v564_v35 = vadd.f32 %v681_v27, %v550_v28  ;;  %v565_v36 = vadd.f32 %v681_v27, %v551_v29  ;;  %v566_v37 = vadd.f32 %v681_v27, %v552_v30  ;;  %v567_v38 = vadd.f32 %v681_v27, %v553_v31 }
 0x156   :  { %v568_v39 = vadd.f32 %v681_v27, %v554_v32  ;;  %v569_v40 = vadd.f32 %v681_v27, %v555_v33  ;;  %v570_v41 = vadd.f32 %v681_v27, %v556_v34 }
 0x157   :  { %vm571_vm1 = vcmp.gt.f32.partialorder %v564_v35, 0.0  ;;  %vm572_vm2 = vcmp.gt.f32.partialorder %v565_v36, 0.0  ;;  %vm573_vm3 = vcmp.gt.f32.partialorder %v566_v37, 0.0  ;;  %vm574_vm4 = vcmp.gt.f32.partialorder %v567_v38, 0.0 }
 0x158   :  { %vm575_vm5 = vcmp.gt.f32.partialorder %v568_v39, 0.0  ;;  %vm576_vm6 = vcmp.gt.f32.partialorder %v569_v40, 0.0  ;;  %vm577_vm7 = vcmp.gt.f32.partialorder %v570_v41, 0.0  ;;  %v578_v42 = vmul.f32 0.2, %v564_v35 }
 0x159   :  { %v579_v43 = vmul.f32 0.2, %v565_v36  ;;  %v580_v44 = vmul.f32 0.2, %v566_v37  ;;  %v581_v45 = vmul.f32 0.2, %v567_v38 }
 0x15a   :  { %v582_v46 = vmul.f32 0.2, %v568_v39  ;;  %v583_v47 = vmul.f32 0.2, %v569_v40  ;;  %v584_v48 = vmul.f32 0.2, %v570_v41  ;;  %v585_v49 = vsel %vm571_vm1, %v564_v35, %v578_v42 }
 0x15b   :  { %v586_v50 = vsel %vm572_vm2, %v565_v36, %v579_v43  ;;  %v587_v51 = vsel %vm573_vm3, %v566_v37, %v580_v44  ;;  %v588_v52 = vsel %vm574_vm4, %v567_v38, %v581_v45 }
 0x15c   :  { %v589_v53 = vsel %vm575_vm5, %v568_v39, %v582_v46  ;;  %v590_v54 = vsel %vm576_vm6, %v569_v40, %v583_v47  ;;  %v591_v55 = vsel %vm577_vm7, %v570_v41, %v584_v48  ;;  %v699_v56 = vpack.c.bf16 %v586_v50, %v585_v49 }
 0x15d   :  { %v695_v57 = vpack.c.bf16 %v591_v55, %v591_v55  ;;  %v704_v58 = vpack.c.bf16 %v588_v52, %v587_v51  ;;  %v709_v59 = vpack.c.bf16 %v590_v54, %v589_v53 }
 0x15e   :  { %700 = vst [vmem:[%s1036_s4] sm:$0xff] %v699_v56  }
 0x15f   :  { %711 = vst [vmem:[%s1036_s4 + $0x8] sm:$0xff] %v704_v58   ;;  %712 = vst [vmem:[%s1036_s4 + $0x10] sm:$0xff] %v709_v59  }
 0x160   :  { %627 = vst [vmem:[%s1036_s4 + $0x18] sm:$0x1] %v695_v57 }

// kernel: discriminator_forward.5
= control target key start
LH: loop header
LB: loop body
LE: loop exit
PB: predicated region body
PF: predicated region fallthrough
CT: control target
= control target key end

     0   :  { %v1197_v22 = vmov 1966171168   ;;  %v161_v24 = vlaneseq  ;;  %vm1199_vm0 = vmmov 0   ;;  %vm758_vm1 = vcmask 1041408   ;;  %s1487_s1 = inlined_call_operand.vmem [shape: bf16[1024,128], index: 1, kind: input, shape index: {}]   ;;  %s1488_s0 = inlined_call_operand.vmem [shape: bf16[2,1024], index: 0, kind: input, shape index: {}]   ;;  %s1489_s4 = inlined_call_operand.vmem [shape: bf16[128,128], index: 4, kind: input, shape index: {}]   ;;  %s1490_s2 = inlined_call_operand.vmem [shape: f32[1,128], index: 2, kind: input, shape index: {}]   ;;  %s1491_s3 = inlined_call_operand.vmem [shape: f32[1,128], index: 3, kind: input, shape index: {}]   ;;  %s1492_s6 = inlined_call_operand.vmem [shape: f32[1,128], index: 6, kind: input, shape index: {}]   ;;  %s1493_s5 = inlined_call_operand.vmem [shape: f32[1,128], index: 5, kind: input, shape index: {}]   ;;  %s1494_s7 = inlined_call_operand.vmem [shape: f32[2,128], index: 7, kind: output, shape index: {}]  }
   0x1   :  { %v1122_v0 = vld [vmem:[%s1487_s1 + $0x40] sm:$0xff]   ;;  %v1126_v4 = vld [vmem:[%s1487_s1 + $0x48] sm:$0xff]   ;;  %v1130_v8 = vld [vmem:[%s1487_s1 + $0x50] sm:$0xff]   ;;  %v159_v23 = vunpack.c.l.s4 %v1197_v22 }
   0x2   :  { %v1123_v1 = vld [vmem:[%s1487_s1 + $0xc0] sm:$0xff]   ;;  %1002 = vmatprep.subr.bf16.mxu0 %v1122_v0  ;;  %v1127_v5 = vld [vmem:[%s1487_s1 + $0xc8] sm:$0xff]   ;;  %v1131_v9 = vld [vmem:[%s1487_s1 + $0xd0] sm:$0xff]   ;;  %v162_v30 = vshrl.u32 %v161_v24, 7 }
   0x3   :  { %v1124_v2 = vld [vmem:[%s1487_s1] sm:$0xff]   ;;  %1024 = vmatprep.subr.bf16.mxu1 %v1123_v1  ;;  %v1128_v6 = vld [vmem:[%s1487_s1 + $0x8] sm:$0xff]   ;;  %v1132_v10 = vld [vmem:[%s1487_s1 + $0x10] sm:$0xff]   ;;  %v160_v29 = vunpack.c.0.s8 %v159_v23 }
   0x4   :  { %v1125_v3 = vld [vmem:[%s1487_s1 + $0x80] sm:$0xff]   ;;  %1003 = vmatpush3.bf16.msra.mxu0 %v1124_v2  ;;  %v1129_v7 = vld [vmem:[%s1487_s1 + $0x88] sm:$0xff]   ;;  %v1133_v11 = vld [vmem:[%s1487_s1 + $0x90] sm:$0xff]  }
   0x5   :  { %1025 = vmatpush3.bf16.msra.mxu1 %v1125_v3  ;;  %1004 = vmatprep.subr.bf16.mxu0 %v1126_v4  ;;  %v1134_v12 = vld [vmem:[%s1487_s1 + $0x58] sm:$0xff]   ;;  %v1138_v16 = vld [vmem:[%s1487_s1 + $0x60] sm:$0xff]   ;;  %v1142_v20 = vld [vmem:[%s1487_s1 + $0x68] sm:$0xff]   ;;  %v1330_v35 = vsub.s32 %v160_v29, %v162_v30 }
   0x6   :  { %1026 = vmatprep.subr.bf16.mxu1 %v1127_v5  ;;  %v1135_v13 = vld [vmem:[%s1487_s1 + $0xd8] sm:$0xff]   ;;  %v1139_v17 = vld [vmem:[%s1487_s1 + $0xe0] sm:$0xff]   ;;  %v1143_v21 = vld [vmem:[%s1487_s1 + $0xe8] sm:$0xff]  }
   0x7   :  { %v1136_v14 = vld [vmem:[%s1487_s1 + $0x18] sm:$0xff]   ;;  %v1140_v18 = vld [vmem:[%s1487_s1 + $0x20] sm:$0xff]   ;;  %v1144_v25 = vld [vmem:[%s1487_s1 + $0x28] sm:$0xff]  }
   0x8   :  { %1005 = vmatpush3.bf16.msra.mxu0 %v1128_v6  ;;  %v1137_v15 = vld [vmem:[%s1487_s1 + $0x98] sm:$0xff]   ;;  %v1141_v19 = vld [vmem:[%s1487_s1 + $0xa0] sm:$0xff]   ;;  %v1145_v26 = vld [vmem:[%s1487_s1 + $0xa8] sm:$0xff]  }
   0x9   :  { %1027 = vmatpush3.bf16.msra.mxu1 %v1129_v7  ;;  %1006 = vmatprep.subr.bf16.mxu0 %v1130_v8  ;;  %v1146_v27 = vld [vmem:[%s1487_s1 + $0x70] sm:$0xff]   ;;  %v1150_v33 = vld [vmem:[%s1487_s1 + $0x78] sm:$0xff]   ;;  %v27_v38 = vld [vmem:[%s1488_s0] sm:$0xff] }
   0xa   :  { %1028 = vmatprep.subr.bf16.mxu1 %v1131_v9  ;;  %v1147_v28 = vld [vmem:[%s1487_s1 + $0xf0] sm:$0xff]   ;;  %v1151_v34 = vld [vmem:[%s1487_s1 + $0xf8] sm:$0xff]   ;;  %v157_v39 = vcombine.high %v27_v38, %v27_v38  ;;  %v164_v40 = vrot.slane %v27_v38, %v1330_v35  ;;  %v1155_v41 = vld [vmem:[%s1487_s1 + $0x140] sm:$0xff]  }
   0xb   :  { %v1148_v31 = vld [vmem:[%s1487_s1 + $0x30] sm:$0xff]   ;;  %v1152_v36 = vld [vmem:[%s1487_s1 + $0x38] sm:$0xff]   ;;  %v1156_v42 = vld [vmem:[%s1487_s1 + $0x1c0] sm:$0xff]  }
   0xc   :  { %1007 = vmatpush3.bf16.msra.mxu0 %v1132_v10  ;;  %v1149_v32 = vld [vmem:[%s1487_s1 + $0xb0] sm:$0xff]   ;;  %v1153_v37 = vld [vmem:[%s1487_s1 + $0xb8] sm:$0xff]   ;;  %v172_v43 = vcombine.high %v164_v40, %v164_v40  ;;  %v180_v44 = vrot.slane %v164_v40, %v1330_v35  ;;  %v1350_v45 = vrot.slane %v157_v39, %v1330_v35  ;;  %v1157_v47 = vld [vmem:[%s1487_s1 + $0x100] sm:$0xff]  }
   0xd   :  { %1029 = vmatpush3.bf16.msra.mxu1 %v1133_v11  ;;  %1008 = vmatprep.subr.bf16.mxu0 %v1134_v12  ;;  %v1159_v50 = vld [vmem:[%s1487_s1 + $0x148] sm:$0xff]   ;;  %v1158_v52 = vld [vmem:[%s1487_s1 + $0x180] sm:$0xff]   ;;  %v1163_v57 = vld [vmem:[%s1487_s1 + $0x150] sm:$0xff]  }
   0xe   :  { %1030 = vmatprep.subr.bf16.mxu1 %v1135_v13  ;;  %v194_v46 = vrot.slane %v172_v43, %v1330_v35  ;;  %v173_v48 = vcombine.high %v1350_v45, %v1350_v45  ;;  %v202_v49 = vcombine.high %v180_v44, %v180_v44  ;;  %v1160_v54 = vld [vmem:[%s1487_s1 + $0x1c8] sm:$0xff]   ;;  %v1164_v59 = vld [vmem:[%s1487_s1 + $0x1d0] sm:$0xff]   ;;  %v1167_v61 = vld [vmem:[%s1487_s1 + $0x158] sm:$0xff]  }
   0xf   :  { %v1161_v55 = vld [vmem:[%s1487_s1 + $0x108] sm:$0xff]   ;;  %v1165_v60 = vld [vmem:[%s1487_s1 + $0x110] sm:$0xff]   ;;  %v1168_v63 = vld [vmem:[%s1487_s1 + $0x1d8] sm:$0xff]  }
  0x10   :  { %1009 = vmatpush3.bf16.msra.mxu0 %v1136_v14  ;;  %630 = vmatprep.mubr.bf16.mxu0 %v194_v46  ;;  %v204_v51 = vcombine.high %v194_v46, %v194_v46  ;;  %v201_v53 = vrot.slane %v173_v48, %v1330_v35  ;;  %v1162_v58 = vld [vmem:[%s1487_s1 + $0x188] sm:$0xff]   ;;  %v1166_v62 = vld [vmem:[%s1487_s1 + $0x190] sm:$0xff]   ;;  %v1169_v0 = vld [vmem:[%s1487_s1 + $0x118] sm:$0xff]  }
  0x11   :  { %1031 = vmatpush3.bf16.msra.mxu1 %v1137_v15  ;;  %1010 = vmatprep.subr.bf16.mxu0 %v1138_v16  ;;  %v1171_v1 = vld [vmem:[%s1487_s1 + $0x160] sm:$0xff]   ;;  %v1170_v2 = vld [vmem:[%s1487_s1 + $0x198] sm:$0xff]   ;;  %v1175_v5 = vld [vmem:[%s1487_s1 + $0x168] sm:$0xff]  }
  0x12   :  { %1032 = vmatprep.subr.bf16.mxu1 %v1139_v17  ;;  %670 = vmatprep.mubr.bf16.mxu1 %v204_v51  ;;  %v205_v56 = vcombine.high %v201_v53, %v201_v53  ;;  %v1172_v3 = vld [vmem:[%s1487_s1 + $0x1e0] sm:$0xff]   ;;  %v1176_v7 = vld [vmem:[%s1487_s1 + $0x1e8] sm:$0xff]   ;;  %v1179_v9 = vld [vmem:[%s1487_s1 + $0x170] sm:$0xff]   ;;  %v187_v17 = vrot.slane %v1350_v45, %v1330_v35 }
  0x13   :  { %v1173_v4 = vld [vmem:[%s1487_s1 + $0x120] sm:$0xff]   ;;  %v1177_v8 = vld [vmem:[%s1487_s1 + $0x128] sm:$0xff]   ;;  %v1180_v11 = vld [vmem:[%s1487_s1 + $0x1f0] sm:$0xff]  }
  0x14   :  { %1011 = vmatpush3.bf16.msra.mxu0 %v1140_v18  ;;  %v1174_v6 = vld [vmem:[%s1487_s1 + $0x1a0] sm:$0xff]   ;;  %v1178_v10 = vld [vmem:[%s1487_s1 + $0x1a8] sm:$0xff]   ;;  %v1181_v12 = vld [vmem:[%s1487_s1 + $0x130] sm:$0xff]  }
  0x15   :  { %1033 = vmatpush3.bf16.msra.mxu1 %v1141_v19  ;;  %1012 = vmatprep.subr.bf16.mxu0 %v1142_v20  ;;  %v1183_v13 = vld [vmem:[%s1487_s1 + $0x178] sm:$0xff]   ;;  %v1182_v14 = vld [vmem:[%s1487_s1 + $0x1b0] sm:$0xff]   ;;  %v203_v19 = vcombine.high %v187_v17, %v187_v17  ;;  %v1187_v20 = vld [vmem:[%s1489_s4] sm:$0xff]  }
  0x16   :  { %1034 = vmatprep.subr.bf16.mxu1 %v1143_v21  ;;  %v1184_v15 = vld [vmem:[%s1487_s1 + $0x1f8] sm:$0xff]   ;;  %v1198_v21 = vmov 0.0   ;;  %v1188_v22 = vld [vmem:[%s1489_s4 + $0x8] sm:$0xff]   ;;  %v1189_v23 = vld [vmem:[%s1489_s4 + $0x10] sm:$0xff]  }
  0x17   :  { %v1185_v16 = vld [vmem:[%s1487_s1 + $0x138] sm:$0xff]  }
  0x18   :  { %1013 = vmatpush3.bf16.msra.mxu0 %v1144_v25  ;;  %v1186_v18 = vld [vmem:[%s1487_s1 + $0x1b8] sm:$0xff]   ;;  %v1191_v25 = vld [vmem:[%s1489_s4 + $0x20] sm:$0xff]  }
  0x19   :  { %1035 = vmatpush3.bf16.msra.mxu1 %v1145_v26  ;;  %1014 = vmatprep.subr.bf16.mxu0 %v1146_v27  ;;  %v1190_v24 = vld [vmem:[%s1489_s4 + $0x18] sm:$0xff]   ;;  %v1192_v26 = vld [vmem:[%s1489_s4 + $0x28] sm:$0xff]   ;;  %v1193_v27 = vld [vmem:[%s1489_s4 + $0x30] sm:$0xff]  }
  0x1a   :  { %1036 = vmatprep.subr.bf16.mxu1 %v1147_v28  ;;  %v1194_v28 = vld [vmem:[%s1489_s4 + $0x38] sm:$0xff]  }
  0x1c   :  { %1015 = vmatpush3.bf16.msra.mxu0 %v1148_v31 }
  0x1d   :  { %1037 = vmatpush3.bf16.msra.mxu1 %v1149_v32  ;;  %1016 = vmatprep.subr.bf16.mxu0 %v1150_v33 }
  0x1e   :  { %1038 = vmatprep.subr.bf16.mxu1 %v1151_v34 }
  0x20   :  { %1017 = vmatpush3.bf16.msra.mxu0 %v1152_v36 }
  0x21   :  { %1039 = vmatpush3.bf16.msra.mxu1 %v1153_v37  ;;  %1046 = vmatprep.subr.bf16.mxu0 %v1155_v41 }
  0x22   :  { %1068 = vmatprep.subr.bf16.mxu1 %v1156_v42 }
  0x23   :  { %631 = vmatmul.mubr.bf16.vlgmr.msra.gmra.mrb[0].mxu0 %v180_v44 }
  0x24   :  { %1047 = vmatpush3.bf16.msra.mxu0 %v1157_v47  ;;  %671 = vmatmul.mubr.bf16.vlgmr.msra.gmra.mrb[0].mxu1 %v202_v49 }
  0x25   :  { %1048 = vmatprep.subr.bf16.mxu0 %v1159_v50  ;;  %1069 = vmatpush3.bf16.msra.mxu1 %v1158_v52 }
  0x26   :  { %710 = vmatprep.mubr.bf16.mxu0 %v201_v53  ;;  %1070 = vmatprep.subr.bf16.mxu1 %v1160_v54 }
  0x27   :  { %750 = vmatprep.mubr.bf16.mxu1 %v205_v56 }
  0x28   :  { %1049 = vmatpush3.bf16.msra.mxu0 %v1161_v55 }
  0x29   :  { %1050 = vmatprep.subr.bf16.mxu0 %v1163_v57  ;;  %1071 = vmatpush3.bf16.msra.mxu1 %v1162_v58 }
  0x2a   :  { %1072 = vmatprep.subr.bf16.mxu1 %v1164_v59 }
  0x2c   :  { %1051 = vmatpush3.bf16.msra.mxu0 %v1165_v60 }
  0x2d   :  { %1052 = vmatprep.subr.bf16.mxu0 %v1167_v61  ;;  %1073 = vmatpush3.bf16.msra.mxu1 %v1166_v62 }
  0x2e   :  { %1074 = vmatprep.subr.bf16.mxu1 %v1168_v63 }
  0x30   :  { %1053 = vmatpush3.bf16.msra.mxu0 %v1169_v0 }
  0x31   :  { %1054 = vmatprep.subr.bf16.mxu0 %v1171_v1  ;;  %1075 = vmatpush3.bf16.msra.mxu1 %v1170_v2 }
  0x32   :  { %1076 = vmatprep.subr.bf16.mxu1 %v1172_v3 }
  0x34   :  { %1055 = vmatpush3.bf16.msra.mxu0 %v1173_v4 }
  0x35   :  { %1056 = vmatprep.subr.bf16.mxu0 %v1175_v5  ;;  %1077 = vmatpush3.bf16.msra.mxu1 %v1174_v6 }
  0x36   :  { %1078 = vmatprep.subr.bf16.mxu1 %v1176_v7 }
  0x38   :  { %1057 = vmatpush3.bf16.msra.mxu0 %v1177_v8  ;;  %v990_v8 = vld [vmem:[%s1490_s2] ss:$0 sm:$0xff] }
  0x39   :  { %1058 = vmatprep.subr.bf16.mxu0 %v1179_v9  ;;  %1079 = vmatpush3.bf16.msra.mxu1 %v1178_v10  ;;  %v991_v10 = vld [vmem:[%s1491_s3] ss:$0 sm:$0xff] }
  0x3a   :  { %1080 = vmatprep.subr.bf16.mxu1 %v1180_v11 }
  0x3c   :  { %1059 = vmatpush3.bf16.msra.mxu0 %v1181_v12 }
  0x3d   :  { %1060 = vmatprep.subr.bf16.mxu0 %v1183_v13  ;;  %1081 = vmatpush3.bf16.msra.mxu1 %v1182_v14 }
  0x3e   :  { %1082 = vmatprep.subr.bf16.mxu1 %v1184_v15 }
  0x40   :  { %1061 = vmatpush3.bf16.msra.mxu0 %v1185_v16  ;;  %v992_v16 = vld [vmem:[%s1492_s6] ss:$0 sm:$0xff] }
  0x41   :  { %1083 = vmatpush3.bf16.msra.mxu1 %v1186_v18  ;;  %1099 = vmatprep.subr.bf16.mxu0 %v1198_v21 }
  0x43   :  { %711 = vmatmul.mubr.bf16.vlgmr.msra.gmra.mrb[4].mxu0 %v187_v17 }
  0x44   :  { %751 = vmatmul.mubr.bf16.vlgmr.msra.gmra.mrb[4].mxu1 %v203_v19  ;;  %1100 = vmatpush3.bf16.msra.mxu0 %v1187_v20  ;;  %v1001_v19 = vld [vmem:[%s1493_s5] ss:$0 sm:$0xff] }
  0x45   :  { %1101 = vmatprep.subr.bf16.mxu0 %v1198_v21  ;;  %1115 = vmatprep.mubr.msk.bf16.mxu0 %vm1199_vm0, %v1198_v21 }
  0x48   :  { %1102 = vmatpush3.bf16.msra.mxu0 %v1188_v22 }
  0x49   :  { %1103 = vmatprep.subr.bf16.mxu0 %v1198_v21 }
  0x4c   :  { %1104 = vmatpush3.bf16.msra.mxu0 %v1189_v23 }
  0x4d   :  { %1105 = vmatprep.subr.bf16.mxu0 %v1198_v21 }
  0x50   :  { %1106 = vmatpush3.bf16.msra.mxu0 %v1190_v24 }
  0x51   :  { %1107 = vmatprep.subr.bf16.mxu0 %v1198_v21 }
  0x54   :  { %1108 = vmatpush3.bf16.msra.mxu0 %v1191_v25 }
  0x55   :  { %1109 = vmatprep.subr.bf16.mxu0 %v1198_v21 }
  0x58   :  { %1110 = vmatpush3.bf16.msra.mxu0 %v1192_v26 }
  0x59   :  { %1111 = vmatprep.subr.bf16.mxu0 %v1198_v21 }
  0x5c   :  { %1112 = vmatpush3.bf16.msra.mxu0 %v1193_v27 }
  0x5d   :  { %1113 = vmatprep.subr.bf16.mxu0 %v1198_v21 }
  0x60   :  { %1114 = vmatpush3.bf16.msra.mxu0 %v1194_v28 }
  0xf6   :  { %v1018_v29 = vpop.f32.mrb[0].mxu0 }
  0xf7   :  { %v1019_v30 = vpop.f32.mrb[1].mxu0  ;;  %v1040_v31 = vpop.f32.mrb[0].mxu1 }
  0xf8   :  { %v1020_v32 = vadd.f32 %v1019_v30, %v1018_v29  ;;  %v1021_v33 = vpop.f32.mrb[2].mxu0  ;;  %v1041_v34 = vpop.f32.mrb[1].mxu1 }
  0xf9   :  { %v1022_v35 = vpop.f32.mrb[3].mxu0  ;;  %v1042_v36 = vadd.f32 %v1041_v34, %v1040_v31  ;;  %v1043_v37 = vpop.f32.mrb[2].mxu1 }
  0xfa   :  { %v1044_v38 = vpop.f32.mrb[3].mxu1 }
  0xfb   :  { %v673_v39 = vadd.f32 %v1042_v36, %v1020_v32 }
 0x116   :  { %v1062_v40 = vpop.f32.mrb[4].mxu0 }
 0x117   :  { %v1063_v41 = vpop.f32.mrb[5].mxu0  ;;  %v1084_v42 = vpop.f32.mrb[4].mxu1 }
 0x118   :  { %v1064_v43 = vadd.f32 %v1063_v41, %v1062_v40  ;;  %v1065_v44 = vpop.f32.mrb[6].mxu0  ;;  %v1085_v45 = vpop.f32.mrb[5].mxu1 }
 0x119   :  { %v1066_v46 = vpop.f32.mrb[7].mxu0  ;;  %v1086_v48 = vadd.f32 %v1085_v45, %v1084_v42  ;;  %v1087_v49 = vpop.f32.mrb[6].mxu1 }
 0x11a   :  { %v713_v47 = vadd.f32 %v1064_v43, %v673_v39  ;;  %v1088_v50 = vpop.f32.mrb[7].mxu1 }
 0x11c   :  { %v753_v51 = vadd.f32 %v1086_v48, %v713_v47 }
 0x11e   :  { %v759_v52 = vsel %vm758_vm1, %v753_v51, 0.0  ;;  %v824_v17 = vmul.f32 %v992_v16, %v753_v51 }
 0x11f   :  { %v760_v53 = vrot.slane %v759_v52, 4 }
 0x121   :  { %v761_v54 = vadd.f32 %v760_v53, %v759_v52 }
 0x123   :  { %v762_v55 = vrot.slane %v761_v54, 2 }
 0x125   :  { %v763_v56 = vadd.f32 %v762_v55, %v761_v54 }
 0x127   :  { %v764_v57 = vrot.slane %v763_v56, 1 }
 0x129   :  { %v765_v58 = vadd.f32 %v764_v57, %v763_v56 }
 0x12b   :  { %v767_v59 = vmul.f32 0.5, %v765_v58 }
 0x12d   :  { %v768_v60 = vsub.f32 %v753_v51, %v767_v59 }
 0x12f   :  { %v769_v61 = vmul.f32 %v768_v60, %v768_v60 }
 0x131   :  { %v770_v62 = vsel %vm758_vm1, %v769_v61, 0.0 }
 0x132   :  { %v771_v63 = vrot.slane %v770_v62, 4 }
 0x134   :  { %v772_v0 = vadd.f32 %v771_v63, %v770_v62 }
 0x136   :  { %v773_v1 = vrot.slane %v772_v0, 2 }
 0x138   :  { %v774_v2 = vadd.f32 %v773_v1, %v772_v0 }
 0x13a   :  { %v775_v3 = vrot.slane %v774_v2, 1 }
 0x13c   :  { %v776_v4 = vadd.f32 %v775_v3, %v774_v2 }
 0x13e   :  { %v777_v5 = vmul.f32 0.5, %v776_v4 }
 0x140   :  { %v778_v6 = vadd.f32 1e-05, %v777_v5 }
 0x142   :  { %1195 = vrsqrt.f32 %v778_v6 }
 0x14c   :  { %v1196_v7 = vpop.eup %1195 }
 0x14d   :  { %v780_v9 = vmul.f32 %v1196_v7, %v768_v60 }
 0x14f   :  { %v788_v11 = vmul.f32 %v990_v8, %v780_v9 }
 0x151   :  { %v796_v12 = vadd.f32 %v991_v10, %v788_v11 }
 0x153   :  { %vm797_vm2 = vcmp.gt.f32.partialorder %v796_v12, 0.0  ;;  %v798_v13 = vmul.f32 0.2, %v796_v12 }
 0x155   :  { %v799_v14 = vsel %vm797_vm2, %v796_v12, %v798_v13 }
 0x156   :  { %v800_v15 = vpack.c.bf16 %v799_v14, %v799_v14 }
 0x158   :  { %1116 = vmatmul.mubr.bf16.vlgmr.msra.gmra.mrb[8].mxu0 %v800_v15 }
 0x22b   :  { %v907_v18 = vpop.f32.mrb[8].mxu0 }
 0x22c   :  { %v908_v20 = vadd.f32 %v907_v18, %v824_v17  ;;  %v1117_v21 = vpop.f32.mrb[9].mxu0 }
 0x22d   :  { %v910_v22 = vpop.f32.mrb[10].mxu0 }
 0x22e   :  { %v920_v23 = vadd.f32 %v1001_v19, %v908_v20  ;;  %v1118_v24 = vpop.f32.mrb[11].mxu0 }
 0x230   :  { %921 = vst [vmem:[%s1494_s7] sm:$0x3] %v920_v23 }

</bundles_post_ra>
